<compile_context>
chip_gen: v6e
topology: v6e:2x2x1
jax: 0.10.0
libtpu: 0.0.40
codegen_flags: <defaults>
</compile_context>

<pallas_src>
import functools
import math

import jax
import jax.numpy as jnp
from jax.experimental import pallas as pl
from jax.experimental.pallas import tpu as pltpu


_PACK_ORDER = ("ln_g", "ln_b", "wq", "bq", "wk", "bk", "wv", "bv",
               "wo", "bo", "w1", "b1", "w2", "b2")


# ------------------------------ fused kernel --------------------------------

def _decoder_layer_kernel(dec_ref, enc_ref, tmask_ref, smask_ref,
                          ln_g_ref, ln_b_ref,
                          wq_ref, bq_ref, wk_ref, bk_ref, wv_ref, bv_ref,
                          wo_ref, bo_ref, w1_ref, b1_ref, w2_ref, b2_ref,
                          out_ref, *, n_head):
    f32 = jnp.float32
    dec = dec_ref[...].astype(f32)     # (Lq, H)
    enc = enc_ref[...].astype(f32)     # (Lk, H)
    tmask = tmask_ref[...]             # (Lq, Lq)
    smask = smask_ref[...]             # (Lq, Lk)

    def layer_norm(x, i):
        # nn.LayerNorm(hidden, eps=1e-5); stats in f32.
        mu = jnp.mean(x, axis=-1, keepdims=True)
        var = jnp.mean(jnp.square(x - mu), axis=-1, keepdims=True)
        return (x - mu) * jax.lax.rsqrt(var + 1e-5) * ln_g_ref[i] + ln_b_ref[i]

    def mha(x_q, kv, mask, sel):
        # All heads of this batch element in one grid step.  The output
        # projection is accumulated per head so the head-concat never
        # materializes and no transposes/reshapes are needed.
        acc = jnp.zeros(x_q.shape, f32)
        for h in range(n_head):
            i = sel * n_head + h
            q = jnp.dot(x_q, wq_ref[i], preferred_element_type=f32) + bq_ref[i]
            k = jnp.dot(kv, wk_ref[i], preferred_element_type=f32) + bk_ref[i]
            v = jnp.dot(kv, wv_ref[i], preferred_element_type=f32) + bv_ref[i]
            # scores (Lq, Lk); 1/sqrt(d_head) already folded into q weights.
            s = jax.lax.dot_general(q, k, (((1,), (1,)), ((), ())),
                                    preferred_element_type=f32)
            s = jnp.where(mask == 0.0, -10000.0, s)          # masked_fill
            s = s - jnp.max(s, axis=-1, keepdims=True)
            p = jnp.exp(s)
            p = p * pl.reciprocal(jnp.sum(p, axis=-1, keepdims=True),
                                  approx=True)
            o = jnp.dot(p, v, preferred_element_type=f32)    # (Lq, d)
            acc = acc + jnp.dot(o, wo_ref[i], preferred_element_type=f32)
        return acc + bo_ref[sel]

    # Pre-LN self-attention + residual (dropout = identity).
    x = layer_norm(dec, 0)
    dec = dec + mha(x, x, tmask, 0)

    # Pre-LN encoder-decoder attention + residual (K/V from raw enc).
    x = layer_norm(dec, 1)
    dec = dec + mha(x, enc, smask, 1)

    # Pre-LN FFN: Linear -> exact (erf) GELU -> Linear, fully fused; the
    # (Lq, ffn_hidden) intermediate never leaves VMEM.
    x = layer_norm(dec, 2)
    hdn = jnp.dot(x, w1_ref[...], preferred_element_type=f32) + b1_ref[...]
    hdn = 0.5 * hdn * (1.0 + jax.lax.erf(hdn * (1.0 / math.sqrt(2.0))))
    y = jnp.dot(hdn, w2_ref[...], preferred_element_type=f32) + b2_ref[...]
    dec = dec + y

    out_ref[...] = dec.astype(out_ref.dtype)


# ------------------------------ wrapper --------------------------------------

def decoder_layer(dec, enc, trg_mask, src_mask, packed, *, n_head):
    B, Lq, H = dec.shape
    Lk = enc.shape[1]
    Fh = packed["w1"].shape[1]

    # Masks arrive in the reference (B, 1, Lq, Lk) shape; dropping the size-1
    # head axis is a metadata-only reshape.
    tmask = trg_mask.reshape(B, Lq, Lq).astype(jnp.float32)
    smask = src_mask.reshape(B, Lq, Lk).astype(jnp.float32)
    weights = [packed[k] for k in _PACK_ORDER]

    def batch_spec(shape):
        nd = len(shape)
        return pl.BlockSpec((None,) + tuple(shape[1:]),
                            lambda b, _n=nd: (b,) + (0,) * (_n - 1))

    def const_spec(w):
        return pl.BlockSpec(tuple(w.shape), lambda b, _n=w.ndim: (0,) * _n)

    in_specs = [batch_spec(dec.shape), batch_spec(enc.shape),
                batch_spec(tmask.shape), batch_spec(smask.shape)]
    in_specs += [const_spec(w) for w in weights]

    # Advisory cost estimate for XLA scheduling around the fused call.
    flops = 2 * B * (4 * Lq * H * H                     # self q/k/v/out proj
                     + 2 * Lq * H * H + 2 * Lk * H * H  # cross q/out + k/v
                     + 2 * Lq * Lq * H + 2 * Lq * Lk * H  # attention cores
                     + 2 * Lq * H * Fh)                 # FFN
    trans = B * (n_head * (Lq * Lq + Lq * Lk) + Lq * Fh)
    bytes_accessed = sum(int(a.size) * a.dtype.itemsize
                         for a in [dec, enc, tmask, smask] + weights)
    bytes_accessed += B * Lq * H * dec.dtype.itemsize
    cost = pl.CostEstimate(flops=int(flops), transcendentals=int(trans),
                           bytes_accessed=int(bytes_accessed))

    return pl.pallas_call(
        functools.partial(_decoder_layer_kernel, n_head=n_head),
        out_shape=jax.ShapeDtypeStruct((B, Lq, H), dec.dtype),
        grid=(B,),
        in_specs=in_specs,
        out_specs=pl.BlockSpec((None, Lq, H), lambda b: (b, 0, 0)),
        compiler_params=pltpu.CompilerParams(
            dimension_semantics=("parallel",)),   # shards batches across TCs (v7x)
        cost_estimate=cost,
    )(dec, enc, tmask, smask, *weights)


# --------------------------- parameter handling ------------------------------

def init_params(key, hidden, ffn_hidden):
    """PyTorch nn.Linear layout: w (out, in), b (out,)."""
    def dense(k, out_dim, in_dim):
        kw, kb = jax.random.split(k)
        return (0.02 * jax.random.normal(kw, (out_dim, in_dim), jnp.float32),
                0.02 * jax.random.normal(kb, (out_dim,), jnp.float32))

    keys = jax.random.split(key, 12)

    def attn_params(ks):
        w_q, b_q = dense(ks[0], hidden, hidden)
        w_k, b_k = dense(ks[1], hidden, hidden)
        w_v, b_v = dense(ks[2], hidden, hidden)
        w_o, b_o = dense(ks[3], hidden, hidden)
        return dict(w_q=w_q, b_q=b_q, w_k=w_k, b_k=b_k,
                    w_v=w_v, b_v=b_v, w_o=w_o, b_o=b_o)

    w1, b1 = dense(keys[8], ffn_hidden, hidden)
    w2, b2 = dense(keys[9], hidden, ffn_hidden)

    ones = jnp.ones((1, hidden), jnp.float32)
    zeros = jnp.zeros((1, hidden), jnp.float32)
    return dict(ln1_g=ones, ln1_b=zeros, ln2_g=ones, ln2_b=zeros,
                ln3_g=ones, ln3_b=zeros,
                self_attn=attn_params(keys[0:4]),
                cross_attn=attn_params(keys[4:8]),
                w1=w1, b1=b1, w2=w2, b2=b2)


def pack_params(params, n_head):
    """One-time repack of PyTorch-layout weights into kernel-ready slabs
    (no per-call transposes; attention scale folded into W_q / b_q)."""
    H = params["w1"].shape[1]
    d = H // n_head
    scale = d ** (-0.5)

    def heads_in(w):            # (H, H_in) -> (n_head, H_in, d)
        wt = w.T
        return jnp.stack([wt[:, h * d:(h + 1) * d] for h in range(n_head)], 0)

    def heads_bias(b):          # (H,) -> (n_head, 1, d)
        return jnp.stack([b[h * d:(h + 1) * d].reshape(1, d)
                          for h in range(n_head)], 0)

    def heads_out(w):           # w_o (H, H) -> (n_head, d, H): row slabs of w_o.T
        wt = w.T
        return jnp.stack([wt[h * d:(h + 1) * d, :] for h in range(n_head)], 0)

    sa, ca = params["self_attn"], params["cross_attn"]
    return dict(
        ln_g=jnp.stack([params["ln1_g"], params["ln2_g"], params["ln3_g"]], 0),
        ln_b=jnp.stack([params["ln1_b"], params["ln2_b"], params["ln3_b"]], 0),
        wq=jnp.concatenate([heads_in(sa["w_q"]), heads_in(ca["w_q"])], 0) * scale,
        bq=jnp.concatenate([heads_bias(sa["b_q"]), heads_bias(ca["b_q"])], 0) * scale,
        wk=jnp.concatenate([heads_in(sa["w_k"]), heads_in(ca["w_k"])], 0),
        bk=jnp.concatenate([heads_bias(sa["b_k"]), heads_bias(ca["b_k"])], 0),
        wv=jnp.concatenate([heads_in(sa["w_v"]), heads_in(ca["w_v"])], 0),
        bv=jnp.concatenate([heads_bias(sa["b_v"]), heads_bias(ca["b_v"])], 0),
        wo=jnp.concatenate([heads_out(sa["w_o"]), heads_out(ca["w_o"])], 0),
        bo=jnp.stack([sa["b_o"].reshape(1, H), ca["b_o"].reshape(1, H)], 0),
        w1=params["w1"].T, b1=params["b1"].reshape(1, -1),
        w2=params["w2"].T, b2=params["b2"].reshape(1, -1),
    )


# ----------------------------------- main ------------------------------------

if __name__ == "__main__":
    B, L_dec, L_enc, H, N_HEAD, FFN = 2, 8, 8, 32, 4, 64

    key = jax.random.PRNGKey(0)
    k_dec, k_enc, k_par = jax.random.split(key, 3)

    dec = jax.random.normal(k_dec, (B, L_dec, H), jnp.float32)
    enc = jax.random.normal(k_enc, (B, L_enc, H), jnp.float32)

    # causal target mask, full source mask (1 = keep, 0 = mask out)
    trg_mask = jnp.broadcast_to(
        jnp.tril(jnp.ones((L_dec, L_dec), jnp.float32)),
        (B, 1, L_dec, L_dec))
    src_mask = jnp.ones((B, 1, L_dec, L_enc), jnp.float32)

    params = init_params(k_par, H, FFN)
    packed = pack_params(params, N_HEAD)          # one-time weight repack

    run = jax.jit(functools.partial(decoder_layer, n_head=N_HEAD))
    out = run(dec, enc, trg_mask, src_mask, packed)
    jax.block_until_ready(out)
    assert out.shape == (B, L_dec, H)
    print("KERNEL_OK")
</pallas_src>

<mosaic_0001>
module attributes {stable_mosaic.version = 11 : i64} {
  func.func @_decoder_layer_kernel(%arg0: i32, %arg1: memref<1x8x32xf32, #tpu.memory_space<vmem>>, %arg2: memref<1x8x32xf32, #tpu.memory_space<vmem>>, %arg3: memref<1x8x8xf32, #tpu.memory_space<vmem>>, %arg4: memref<1x8x8xf32, #tpu.memory_space<vmem>>, %arg5: memref<3x1x32xf32, #tpu.memory_space<vmem>>, %arg6: memref<3x1x32xf32, #tpu.memory_space<vmem>>, %arg7: memref<8x32x8xf32, #tpu.memory_space<vmem>>, %arg8: memref<8x1x8xf32, #tpu.memory_space<vmem>>, %arg9: memref<8x32x8xf32, #tpu.memory_space<vmem>>, %arg10: memref<8x1x8xf32, #tpu.memory_space<vmem>>, %arg11: memref<8x32x8xf32, #tpu.memory_space<vmem>>, %arg12: memref<8x1x8xf32, #tpu.memory_space<vmem>>, %arg13: memref<8x8x32xf32, #tpu.memory_space<vmem>>, %arg14: memref<2x1x32xf32, #tpu.memory_space<vmem>>, %arg15: memref<32x64xf32, #tpu.memory_space<vmem>>, %arg16: memref<1x64xf32, #tpu.memory_space<vmem>>, %arg17: memref<64x32xf32, #tpu.memory_space<vmem>>, %arg18: memref<1x32xf32, #tpu.memory_space<vmem>>, %arg19: memref<1x8x32xf32, #tpu.memory_space<vmem>>) attributes {dimension_semantics = [#tpu.dimension_semantics<parallel>], iteration_bounds = array<i64: 2>, scalar_prefetch = 0 : i64, scratch_operands = 0 : i64, tpu.core_type = #tpu.core_type<tc>, window_params = [{transform_indices = @transform_0, window_bounds = array<i64: 1, 8, 32>}, {transform_indices = @transform_1, window_bounds = array<i64: 1, 8, 32>}, {transform_indices = @transform_2, window_bounds = array<i64: 1, 8, 8>}, {transform_indices = @transform_3, window_bounds = array<i64: 1, 8, 8>}, {pipeline_mode = #tpu.pipeline_mode<synchronous>, transform_indices = @transform_4, window_bounds = array<i64: 3, 1, 32>}, {pipeline_mode = #tpu.pipeline_mode<synchronous>, transform_indices = @transform_5, window_bounds = array<i64: 3, 1, 32>}, {pipeline_mode = #tpu.pipeline_mode<synchronous>, transform_indices = @transform_6, window_bounds = array<i64: 8, 32, 8>}, {pipeline_mode = #tpu.pipeline_mode<synchronous>, transform_indices = @transform_7, window_bounds = array<i64: 8, 1, 8>}, {pipeline_mode = #tpu.pipeline_mode<synchronous>, transform_indices = @transform_8, window_bounds = array<i64: 8, 32, 8>}, {pipeline_mode = #tpu.pipeline_mode<synchronous>, transform_indices = @transform_9, window_bounds = array<i64: 8, 1, 8>}, {pipeline_mode = #tpu.pipeline_mode<synchronous>, transform_indices = @transform_10, window_bounds = array<i64: 8, 32, 8>}, {pipeline_mode = #tpu.pipeline_mode<synchronous>, transform_indices = @transform_11, window_bounds = array<i64: 8, 1, 8>}, {pipeline_mode = #tpu.pipeline_mode<synchronous>, transform_indices = @transform_12, window_bounds = array<i64: 8, 8, 32>}, {pipeline_mode = #tpu.pipeline_mode<synchronous>, transform_indices = @transform_13, window_bounds = array<i64: 2, 1, 32>}, {pipeline_mode = #tpu.pipeline_mode<synchronous>, transform_indices = @transform_14, window_bounds = array<i64: 32, 64>}, {pipeline_mode = #tpu.pipeline_mode<synchronous>, transform_indices = @transform_15, window_bounds = array<i64: 1, 64>}, {pipeline_mode = #tpu.pipeline_mode<synchronous>, transform_indices = @transform_16, window_bounds = array<i64: 64, 32>}, {pipeline_mode = #tpu.pipeline_mode<synchronous>, transform_indices = @transform_17, window_bounds = array<i64: 1, 32>}, {transform_indices = @transform_18, window_bounds = array<i64: 1, 8, 32>}]} {
    %c0 = arith.constant 0 : index
    %c0_0 = arith.constant 0 : index
    %c0_1 = arith.constant 0 : index
    %0 = vector.load %arg1[%c0, %c0_0, %c0_1] : memref<1x8x32xf32, #tpu.memory_space<vmem>>, vector<1x8x32xf32>
    %1 = vector.shape_cast %0 : vector<1x8x32xf32> to vector<8x32xf32>
    %c0_2 = arith.constant 0 : index
    %c0_3 = arith.constant 0 : index
    %c0_4 = arith.constant 0 : index
    %2 = vector.load %arg2[%c0_2, %c0_3, %c0_4] : memref<1x8x32xf32, #tpu.memory_space<vmem>>, vector<1x8x32xf32>
    %3 = vector.shape_cast %2 : vector<1x8x32xf32> to vector<8x32xf32>
    %c0_5 = arith.constant 0 : index
    %c0_6 = arith.constant 0 : index
    %c0_7 = arith.constant 0 : index
    %4 = vector.load %arg3[%c0_5, %c0_6, %c0_7] : memref<1x8x8xf32, #tpu.memory_space<vmem>>, vector<1x8x8xf32>
    %5 = vector.shape_cast %4 : vector<1x8x8xf32> to vector<8x8xf32>
    %c0_8 = arith.constant 0 : index
    %c0_9 = arith.constant 0 : index
    %c0_10 = arith.constant 0 : index
    %6 = vector.load %arg4[%c0_8, %c0_9, %c0_10] : memref<1x8x8xf32, #tpu.memory_space<vmem>>, vector<1x8x8xf32>
    %7 = vector.shape_cast %6 : vector<1x8x8xf32> to vector<8x8xf32>
    %cst = arith.constant dense<0.000000e+00> : vector<8xf32>
    %8 = vector.multi_reduction <add>, %1, %cst [1] : vector<8x32xf32> to vector<8xf32>
    %9 = vector.shape_cast %8 : vector<8xf32> to vector<8x1xf32>
    %cst_11 = arith.constant 3.200000e+01 : f32
    %10 = vector.broadcast %cst_11 : f32 to vector<8x1xf32>
    %11 = arith.divf %9, %10 : vector<8x1xf32>
    %12 = vector.broadcast %11 : vector<8x1xf32> to vector<8x32xf32>
    %13 = arith.subf %1, %12 : vector<8x32xf32>
    %14 = arith.mulf %13, %13 : vector<8x32xf32>
    %cst_12 = arith.constant dense<0.000000e+00> : vector<8xf32>
    %15 = vector.multi_reduction <add>, %14, %cst_12 [1] : vector<8x32xf32> to vector<8xf32>
    %16 = vector.shape_cast %15 : vector<8xf32> to vector<8x1xf32>
    %cst_13 = arith.constant 3.200000e+01 : f32
    %17 = vector.broadcast %cst_13 : f32 to vector<8x1xf32>
    %18 = arith.divf %16, %17 : vector<8x1xf32>
    %19 = vector.broadcast %11 : vector<8x1xf32> to vector<8x32xf32>
    %20 = arith.subf %1, %19 : vector<8x32xf32>
    %cst_14 = arith.constant 9.99999974E-6 : f32
    %21 = vector.broadcast %cst_14 : f32 to vector<8x1xf32>
    %22 = arith.addf %18, %21 : vector<8x1xf32>
    %23 = math.rsqrt %22 : vector<8x1xf32>
    %24 = vector.broadcast %23 : vector<8x1xf32> to vector<8x32xf32>
    %25 = arith.mulf %20, %24 : vector<8x32xf32>
    %c0_15 = arith.constant 0 : index
    %c0_16 = arith.constant 0 : index
    %c0_17 = arith.constant 0 : index
    %26 = vector.load %arg5[%c0_15, %c0_16, %c0_17] : memref<3x1x32xf32, #tpu.memory_space<vmem>>, vector<1x1x32xf32>
    %27 = vector.shape_cast %26 : vector<1x1x32xf32> to vector<1x32xf32>
    %28 = vector.broadcast %27 : vector<1x32xf32> to vector<8x32xf32>
    %29 = arith.mulf %25, %28 : vector<8x32xf32>
    %c0_18 = arith.constant 0 : index
    %c0_19 = arith.constant 0 : index
    %c0_20 = arith.constant 0 : index
    %30 = vector.load %arg6[%c0_18, %c0_19, %c0_20] : memref<3x1x32xf32, #tpu.memory_space<vmem>>, vector<1x1x32xf32>
    %31 = vector.shape_cast %30 : vector<1x1x32xf32> to vector<1x32xf32>
    %32 = vector.broadcast %31 : vector<1x32xf32> to vector<8x32xf32>
    %33 = arith.addf %29, %32 : vector<8x32xf32>
    %cst_21 = arith.constant 0.000000e+00 : f32
    %34 = vector.broadcast %cst_21 : f32 to vector<8x32xf32>
    %c0_22 = arith.constant 0 : index
    %c0_23 = arith.constant 0 : index
    %c0_24 = arith.constant 0 : index
    %35 = vector.load %arg7[%c0_22, %c0_23, %c0_24] : memref<8x32x8xf32, #tpu.memory_space<vmem>>, vector<1x32x8xf32>
    %36 = vector.shape_cast %35 : vector<1x32x8xf32> to vector<32x8xf32>
    %cst_25 = arith.constant dense<0.000000e+00> : vector<8x8xf32>
    %37 = tpu.matmul %33, %36, %cst_25 {dimension_numbers = #tpu.dot_dimension_numbers<[1], [0], [0], [1], [0, 0, 1, 1], [], []>} : vector<8x32xf32>, vector<32x8xf32>, vector<8x8xf32> -> vector<8x8xf32>
    %c0_26 = arith.constant 0 : index
    %c0_27 = arith.constant 0 : index
    %c0_28 = arith.constant 0 : index
    %38 = vector.load %arg8[%c0_26, %c0_27, %c0_28] : memref<8x1x8xf32, #tpu.memory_space<vmem>>, vector<1x1x8xf32>
    %39 = vector.shape_cast %38 : vector<1x1x8xf32> to vector<1x8xf32>
    %40 = vector.broadcast %39 : vector<1x8xf32> to vector<8x8xf32>
    %41 = arith.addf %37, %40 : vector<8x8xf32>
    %c0_29 = arith.constant 0 : index
    %c0_30 = arith.constant 0 : index
    %c0_31 = arith.constant 0 : index
    %42 = vector.load %arg9[%c0_29, %c0_30, %c0_31] : memref<8x32x8xf32, #tpu.memory_space<vmem>>, vector<1x32x8xf32>
    %43 = vector.shape_cast %42 : vector<1x32x8xf32> to vector<32x8xf32>
    %cst_32 = arith.constant dense<0.000000e+00> : vector<8x8xf32>
    %44 = tpu.matmul %33, %43, %cst_32 {dimension_numbers = #tpu.dot_dimension_numbers<[1], [0], [0], [1], [0, 0, 1, 1], [], []>} : vector<8x32xf32>, vector<32x8xf32>, vector<8x8xf32> -> vector<8x8xf32>
    %c0_33 = arith.constant 0 : index
    %c0_34 = arith.constant 0 : index
    %c0_35 = arith.constant 0 : index
    %45 = vector.load %arg10[%c0_33, %c0_34, %c0_35] : memref<8x1x8xf32, #tpu.memory_space<vmem>>, vector<1x1x8xf32>
    %46 = vector.shape_cast %45 : vector<1x1x8xf32> to vector<1x8xf32>
    %47 = vector.broadcast %46 : vector<1x8xf32> to vector<8x8xf32>
    %48 = arith.addf %44, %47 : vector<8x8xf32>
    %c0_36 = arith.constant 0 : index
    %c0_37 = arith.constant 0 : index
    %c0_38 = arith.constant 0 : index
    %49 = vector.load %arg11[%c0_36, %c0_37, %c0_38] : memref<8x32x8xf32, #tpu.memory_space<vmem>>, vector<1x32x8xf32>
    %50 = vector.shape_cast %49 : vector<1x32x8xf32> to vector<32x8xf32>
    %cst_39 = arith.constant dense<0.000000e+00> : vector<8x8xf32>
    %51 = tpu.matmul %33, %50, %cst_39 {dimension_numbers = #tpu.dot_dimension_numbers<[1], [0], [0], [1], [0, 0, 1, 1], [], []>} : vector<8x32xf32>, vector<32x8xf32>, vector<8x8xf32> -> vector<8x8xf32>
    %c0_40 = arith.constant 0 : index
    %c0_41 = arith.constant 0 : index
    %c0_42 = arith.constant 0 : index
    %52 = vector.load %arg12[%c0_40, %c0_41, %c0_42] : memref<8x1x8xf32, #tpu.memory_space<vmem>>, vector<1x1x8xf32>
    %53 = vector.shape_cast %52 : vector<1x1x8xf32> to vector<1x8xf32>
    %54 = vector.broadcast %53 : vector<1x8xf32> to vector<8x8xf32>
    %55 = arith.addf %51, %54 : vector<8x8xf32>
    %cst_43 = arith.constant dense<0.000000e+00> : vector<8x8xf32>
    %56 = tpu.matmul %41, %48, %cst_43 {dimension_numbers = #tpu.dot_dimension_numbers<[1], [1], [0], [0], [0, 0, 1, 0], [], []>} : vector<8x8xf32>, vector<8x8xf32>, vector<8x8xf32> -> vector<8x8xf32>
    %cst_44 = arith.constant 0.000000e+00 : f32
    %57 = vector.broadcast %cst_44 : f32 to vector<8x8xf32>
    %58 = arith.cmpf oeq, %5, %57 : vector<8x8xf32>
    %cst_45 = arith.constant -1.000000e+04 : f32
    %59 = vector.broadcast %cst_45 : f32 to vector<8x8xf32>
    %60 = arith.select %58, %59, %56 : vector<8x8xi1>, vector<8x8xf32>
    %cst_46 = arith.constant dense<0xFF800000> : vector<8xf32>
    %61 = vector.multi_reduction <maximumf>, %60, %cst_46 [1] : vector<8x8xf32> to vector<8xf32>
    %62 = vector.shape_cast %61 : vector<8xf32> to vector<8x1xf32>
    %63 = vector.broadcast %62 : vector<8x1xf32> to vector<8x8xf32>
    %64 = arith.subf %60, %63 : vector<8x8xf32>
    %65 = math.exp %64 : vector<8x8xf32>
    %cst_47 = arith.constant dense<0.000000e+00> : vector<8xf32>
    %66 = vector.multi_reduction <add>, %65, %cst_47 [1] : vector<8x8xf32> to vector<8xf32>
    %67 = vector.shape_cast %66 : vector<8xf32> to vector<8x1xf32>
    %68 = tpu.reciprocal %67 {approx = true} : vector<8x1xf32> -> vector<8x1xf32>
    %69 = vector.broadcast %68 : vector<8x1xf32> to vector<8x8xf32>
    %70 = arith.mulf %65, %69 : vector<8x8xf32>
    %cst_48 = arith.constant dense<0.000000e+00> : vector<8x8xf32>
    %71 = tpu.matmul %70, %55, %cst_48 {dimension_numbers = #tpu.dot_dimension_numbers<[1], [0], [0], [1], [0, 0, 1, 1], [], []>} : vector<8x8xf32>, vector<8x8xf32>, vector<8x8xf32> -> vector<8x8xf32>
    %c0_49 = arith.constant 0 : index
    %c0_50 = arith.constant 0 : index
    %c0_51 = arith.constant 0 : index
    %72 = vector.load %arg13[%c0_49, %c0_50, %c0_51] : memref<8x8x32xf32, #tpu.memory_space<vmem>>, vector<1x8x32xf32>
    %73 = vector.shape_cast %72 : vector<1x8x32xf32> to vector<8x32xf32>
    %cst_52 = arith.constant dense<0.000000e+00> : vector<8x32xf32>
    %74 = tpu.matmul %71, %73, %cst_52 {dimension_numbers = #tpu.dot_dimension_numbers<[1], [0], [0], [1], [0, 0, 1, 1], [], []>} : vector<8x8xf32>, vector<8x32xf32>, vector<8x32xf32> -> vector<8x32xf32>
    %75 = arith.addf %34, %74 : vector<8x32xf32>
    %c1 = arith.constant 1 : index
    %c0_53 = arith.constant 0 : index
    %c0_54 = arith.constant 0 : index
    %76 = vector.load %arg7[%c1, %c0_53, %c0_54] : memref<8x32x8xf32, #tpu.memory_space<vmem>>, vector<1x32x8xf32>
    %77 = vector.shape_cast %76 : vector<1x32x8xf32> to vector<32x8xf32>
    %cst_55 = arith.constant dense<0.000000e+00> : vector<8x8xf32>
    %78 = tpu.matmul %33, %77, %cst_55 {dimension_numbers = #tpu.dot_dimension_numbers<[1], [0], [0], [1], [0, 0, 1, 1], [], []>} : vector<8x32xf32>, vector<32x8xf32>, vector<8x8xf32> -> vector<8x8xf32>
    %c1_56 = arith.constant 1 : index
    %c0_57 = arith.constant 0 : index
    %c0_58 = arith.constant 0 : index
    %79 = vector.load %arg8[%c1_56, %c0_57, %c0_58] : memref<8x1x8xf32, #tpu.memory_space<vmem>>, vector<1x1x8xf32>
    %80 = vector.shape_cast %79 : vector<1x1x8xf32> to vector<1x8xf32>
    %81 = vector.broadcast %80 : vector<1x8xf32> to vector<8x8xf32>
    %82 = arith.addf %78, %81 : vector<8x8xf32>
    %c1_59 = arith.constant 1 : index
    %c0_60 = arith.constant 0 : index
    %c0_61 = arith.constant 0 : index
    %83 = vector.load %arg9[%c1_59, %c0_60, %c0_61] : memref<8x32x8xf32, #tpu.memory_space<vmem>>, vector<1x32x8xf32>
    %84 = vector.shape_cast %83 : vector<1x32x8xf32> to vector<32x8xf32>
    %cst_62 = arith.constant dense<0.000000e+00> : vector<8x8xf32>
    %85 = tpu.matmul %33, %84, %cst_62 {dimension_numbers = #tpu.dot_dimension_numbers<[1], [0], [0], [1], [0, 0, 1, 1], [], []>} : vector<8x32xf32>, vector<32x8xf32>, vector<8x8xf32> -> vector<8x8xf32>
    %c1_63 = arith.constant 1 : index
    %c0_64 = arith.constant 0 : index
    %c0_65 = arith.constant 0 : index
    %86 = vector.load %arg10[%c1_63, %c0_64, %c0_65] : memref<8x1x8xf32, #tpu.memory_space<vmem>>, vector<1x1x8xf32>
    %87 = vector.shape_cast %86 : vector<1x1x8xf32> to vector<1x8xf32>
    %88 = vector.broadcast %87 : vector<1x8xf32> to vector<8x8xf32>
    %89 = arith.addf %85, %88 : vector<8x8xf32>
    %c1_66 = arith.constant 1 : index
    %c0_67 = arith.constant 0 : index
    %c0_68 = arith.constant 0 : index
    %90 = vector.load %arg11[%c1_66, %c0_67, %c0_68] : memref<8x32x8xf32, #tpu.memory_space<vmem>>, vector<1x32x8xf32>
    %91 = vector.shape_cast %90 : vector<1x32x8xf32> to vector<32x8xf32>
    %cst_69 = arith.constant dense<0.000000e+00> : vector<8x8xf32>
    %92 = tpu.matmul %33, %91, %cst_69 {dimension_numbers = #tpu.dot_dimension_numbers<[1], [0], [0], [1], [0, 0, 1, 1], [], []>} : vector<8x32xf32>, vector<32x8xf32>, vector<8x8xf32> -> vector<8x8xf32>
    %c1_70 = arith.constant 1 : index
    %c0_71 = arith.constant 0 : index
    %c0_72 = arith.constant 0 : index
    %93 = vector.load %arg12[%c1_70, %c0_71, %c0_72] : memref<8x1x8xf32, #tpu.memory_space<vmem>>, vector<1x1x8xf32>
    %94 = vector.shape_cast %93 : vector<1x1x8xf32> to vector<1x8xf32>
    %95 = vector.broadcast %94 : vector<1x8xf32> to vector<8x8xf32>
    %96 = arith.addf %92, %95 : vector<8x8xf32>
    %cst_73 = arith.constant dense<0.000000e+00> : vector<8x8xf32>
    %97 = tpu.matmul %82, %89, %cst_73 {dimension_numbers = #tpu.dot_dimension_numbers<[1], [1], [0], [0], [0, 0, 1, 0], [], []>} : vector<8x8xf32>, vector<8x8xf32>, vector<8x8xf32> -> vector<8x8xf32>
    %cst_74 = arith.constant 0.000000e+00 : f32
    %98 = vector.broadcast %cst_74 : f32 to vector<8x8xf32>
    %99 = arith.cmpf oeq, %5, %98 : vector<8x8xf32>
    %cst_75 = arith.constant -1.000000e+04 : f32
    %100 = vector.broadcast %cst_75 : f32 to vector<8x8xf32>
    %101 = arith.select %99, %100, %97 : vector<8x8xi1>, vector<8x8xf32>
    %cst_76 = arith.constant dense<0xFF800000> : vector<8xf32>
    %102 = vector.multi_reduction <maximumf>, %101, %cst_76 [1] : vector<8x8xf32> to vector<8xf32>
    %103 = vector.shape_cast %102 : vector<8xf32> to vector<8x1xf32>
    %104 = vector.broadcast %103 : vector<8x1xf32> to vector<8x8xf32>
    %105 = arith.subf %101, %104 : vector<8x8xf32>
    %106 = math.exp %105 : vector<8x8xf32>
    %cst_77 = arith.constant dense<0.000000e+00> : vector<8xf32>
    %107 = vector.multi_reduction <add>, %106, %cst_77 [1] : vector<8x8xf32> to vector<8xf32>
    %108 = vector.shape_cast %107 : vector<8xf32> to vector<8x1xf32>
    %109 = tpu.reciprocal %108 {approx = true} : vector<8x1xf32> -> vector<8x1xf32>
    %110 = vector.broadcast %109 : vector<8x1xf32> to vector<8x8xf32>
    %111 = arith.mulf %106, %110 : vector<8x8xf32>
    %cst_78 = arith.constant dense<0.000000e+00> : vector<8x8xf32>
    %112 = tpu.matmul %111, %96, %cst_78 {dimension_numbers = #tpu.dot_dimension_numbers<[1], [0], [0], [1], [0, 0, 1, 1], [], []>} : vector<8x8xf32>, vector<8x8xf32>, vector<8x8xf32> -> vector<8x8xf32>
    %c1_79 = arith.constant 1 : index
    %c0_80 = arith.constant 0 : index
    %c0_81 = arith.constant 0 : index
    %113 = vector.load %arg13[%c1_79, %c0_80, %c0_81] : memref<8x8x32xf32, #tpu.memory_space<vmem>>, vector<1x8x32xf32>
    %114 = vector.shape_cast %113 : vector<1x8x32xf32> to vector<8x32xf32>
    %cst_82 = arith.constant dense<0.000000e+00> : vector<8x32xf32>
    %115 = tpu.matmul %112, %114, %cst_82 {dimension_numbers = #tpu.dot_dimension_numbers<[1], [0], [0], [1], [0, 0, 1, 1], [], []>} : vector<8x8xf32>, vector<8x32xf32>, vector<8x32xf32> -> vector<8x32xf32>
    %116 = arith.addf %75, %115 : vector<8x32xf32>
    %c2 = arith.constant 2 : index
    %c0_83 = arith.constant 0 : index
    %c0_84 = arith.constant 0 : index
    %117 = vector.load %arg7[%c2, %c0_83, %c0_84] : memref<8x32x8xf32, #tpu.memory_space<vmem>>, vector<1x32x8xf32>
    %118 = vector.shape_cast %117 : vector<1x32x8xf32> to vector<32x8xf32>
    %cst_85 = arith.constant dense<0.000000e+00> : vector<8x8xf32>
    %119 = tpu.matmul %33, %118, %cst_85 {dimension_numbers = #tpu.dot_dimension_numbers<[1], [0], [0], [1], [0, 0, 1, 1], [], []>} : vector<8x32xf32>, vector<32x8xf32>, vector<8x8xf32> -> vector<8x8xf32>
    %c2_86 = arith.constant 2 : index
    %c0_87 = arith.constant 0 : index
    %c0_88 = arith.constant 0 : index
    %120 = vector.load %arg8[%c2_86, %c0_87, %c0_88] : memref<8x1x8xf32, #tpu.memory_space<vmem>>, vector<1x1x8xf32>
    %121 = vector.shape_cast %120 : vector<1x1x8xf32> to vector<1x8xf32>
    %122 = vector.broadcast %121 : vector<1x8xf32> to vector<8x8xf32>
    %123 = arith.addf %119, %122 : vector<8x8xf32>
    %c2_89 = arith.constant 2 : index
    %c0_90 = arith.constant 0 : index
    %c0_91 = arith.constant 0 : index
    %124 = vector.load %arg9[%c2_89, %c0_90, %c0_91] : memref<8x32x8xf32, #tpu.memory_space<vmem>>, vector<1x32x8xf32>
    %125 = vector.shape_cast %124 : vector<1x32x8xf32> to vector<32x8xf32>
    %cst_92 = arith.constant dense<0.000000e+00> : vector<8x8xf32>
    %126 = tpu.matmul %33, %125, %cst_92 {dimension_numbers = #tpu.dot_dimension_numbers<[1], [0], [0], [1], [0, 0, 1, 1], [], []>} : vector<8x32xf32>, vector<32x8xf32>, vector<8x8xf32> -> vector<8x8xf32>
    %c2_93 = arith.constant 2 : index
    %c0_94 = arith.constant 0 : index
    %c0_95 = arith.constant 0 : index
    %127 = vector.load %arg10[%c2_93, %c0_94, %c0_95] : memref<8x1x8xf32, #tpu.memory_space<vmem>>, vector<1x1x8xf32>
    %128 = vector.shape_cast %127 : vector<1x1x8xf32> to vector<1x8xf32>
    %129 = vector.broadcast %128 : vector<1x8xf32> to vector<8x8xf32>
    %130 = arith.addf %126, %129 : vector<8x8xf32>
    %c2_96 = arith.constant 2 : index
    %c0_97 = arith.constant 0 : index
    %c0_98 = arith.constant 0 : index
    %131 = vector.load %arg11[%c2_96, %c0_97, %c0_98] : memref<8x32x8xf32, #tpu.memory_space<vmem>>, vector<1x32x8xf32>
    %132 = vector.shape_cast %131 : vector<1x32x8xf32> to vector<32x8xf32>
    %cst_99 = arith.constant dense<0.000000e+00> : vector<8x8xf32>
    %133 = tpu.matmul %33, %132, %cst_99 {dimension_numbers = #tpu.dot_dimension_numbers<[1], [0], [0], [1], [0, 0, 1, 1], [], []>} : vector<8x32xf32>, vector<32x8xf32>, vector<8x8xf32> -> vector<8x8xf32>
    %c2_100 = arith.constant 2 : index
    %c0_101 = arith.constant 0 : index
    %c0_102 = arith.constant 0 : index
    %134 = vector.load %arg12[%c2_100, %c0_101, %c0_102] : memref<8x1x8xf32, #tpu.memory_space<vmem>>, vector<1x1x8xf32>
    %135 = vector.shape_cast %134 : vector<1x1x8xf32> to vector<1x8xf32>
    %136 = vector.broadcast %135 : vector<1x8xf32> to vector<8x8xf32>
    %137 = arith.addf %133, %136 : vector<8x8xf32>
    %cst_103 = arith.constant dense<0.000000e+00> : vector<8x8xf32>
    %138 = tpu.matmul %123, %130, %cst_103 {dimension_numbers = #tpu.dot_dimension_numbers<[1], [1], [0], [0], [0, 0, 1, 0], [], []>} : vector<8x8xf32>, vector<8x8xf32>, vector<8x8xf32> -> vector<8x8xf32>
    %cst_104 = arith.constant 0.000000e+00 : f32
    %139 = vector.broadcast %cst_104 : f32 to vector<8x8xf32>
    %140 = arith.cmpf oeq, %5, %139 : vector<8x8xf32>
    %cst_105 = arith.constant -1.000000e+04 : f32
    %141 = vector.broadcast %cst_105 : f32 to vector<8x8xf32>
    %142 = arith.select %140, %141, %138 : vector<8x8xi1>, vector<8x8xf32>
    %cst_106 = arith.constant dense<0xFF800000> : vector<8xf32>
    %143 = vector.multi_reduction <maximumf>, %142, %cst_106 [1] : vector<8x8xf32> to vector<8xf32>
    %144 = vector.shape_cast %143 : vector<8xf32> to vector<8x1xf32>
    %145 = vector.broadcast %144 : vector<8x1xf32> to vector<8x8xf32>
    %146 = arith.subf %142, %145 : vector<8x8xf32>
    %147 = math.exp %146 : vector<8x8xf32>
    %cst_107 = arith.constant dense<0.000000e+00> : vector<8xf32>
    %148 = vector.multi_reduction <add>, %147, %cst_107 [1] : vector<8x8xf32> to vector<8xf32>
    %149 = vector.shape_cast %148 : vector<8xf32> to vector<8x1xf32>
    %150 = tpu.reciprocal %149 {approx = true} : vector<8x1xf32> -> vector<8x1xf32>
    %151 = vector.broadcast %150 : vector<8x1xf32> to vector<8x8xf32>
    %152 = arith.mulf %147, %151 : vector<8x8xf32>
    %cst_108 = arith.constant dense<0.000000e+00> : vector<8x8xf32>
    %153 = tpu.matmul %152, %137, %cst_108 {dimension_numbers = #tpu.dot_dimension_numbers<[1], [0], [0], [1], [0, 0, 1, 1], [], []>} : vector<8x8xf32>, vector<8x8xf32>, vector<8x8xf32> -> vector<8x8xf32>
    %c2_109 = arith.constant 2 : index
    %c0_110 = arith.constant 0 : index
    %c0_111 = arith.constant 0 : index
    %154 = vector.load %arg13[%c2_109, %c0_110, %c0_111] : memref<8x8x32xf32, #tpu.memory_space<vmem>>, vector<1x8x32xf32>
    %155 = vector.shape_cast %154 : vector<1x8x32xf32> to vector<8x32xf32>
    %cst_112 = arith.constant dense<0.000000e+00> : vector<8x32xf32>
    %156 = tpu.matmul %153, %155, %cst_112 {dimension_numbers = #tpu.dot_dimension_numbers<[1], [0], [0], [1], [0, 0, 1, 1], [], []>} : vector<8x8xf32>, vector<8x32xf32>, vector<8x32xf32> -> vector<8x32xf32>
    %157 = arith.addf %116, %156 : vector<8x32xf32>
    %c3 = arith.constant 3 : index
    %c0_113 = arith.constant 0 : index
    %c0_114 = arith.constant 0 : index
    %158 = vector.load %arg7[%c3, %c0_113, %c0_114] : memref<8x32x8xf32, #tpu.memory_space<vmem>>, vector<1x32x8xf32>
    %159 = vector.shape_cast %158 : vector<1x32x8xf32> to vector<32x8xf32>
    %cst_115 = arith.constant dense<0.000000e+00> : vector<8x8xf32>
    %160 = tpu.matmul %33, %159, %cst_115 {dimension_numbers = #tpu.dot_dimension_numbers<[1], [0], [0], [1], [0, 0, 1, 1], [], []>} : vector<8x32xf32>, vector<32x8xf32>, vector<8x8xf32> -> vector<8x8xf32>
    %c3_116 = arith.constant 3 : index
    %c0_117 = arith.constant 0 : index
    %c0_118 = arith.constant 0 : index
    %161 = vector.load %arg8[%c3_116, %c0_117, %c0_118] : memref<8x1x8xf32, #tpu.memory_space<vmem>>, vector<1x1x8xf32>
    %162 = vector.shape_cast %161 : vector<1x1x8xf32> to vector<1x8xf32>
    %163 = vector.broadcast %162 : vector<1x8xf32> to vector<8x8xf32>
    %164 = arith.addf %160, %163 : vector<8x8xf32>
    %c3_119 = arith.constant 3 : index
    %c0_120 = arith.constant 0 : index
    %c0_121 = arith.constant 0 : index
    %165 = vector.load %arg9[%c3_119, %c0_120, %c0_121] : memref<8x32x8xf32, #tpu.memory_space<vmem>>, vector<1x32x8xf32>
    %166 = vector.shape_cast %165 : vector<1x32x8xf32> to vector<32x8xf32>
    %cst_122 = arith.constant dense<0.000000e+00> : vector<8x8xf32>
    %167 = tpu.matmul %33, %166, %cst_122 {dimension_numbers = #tpu.dot_dimension_numbers<[1], [0], [0], [1], [0, 0, 1, 1], [], []>} : vector<8x32xf32>, vector<32x8xf32>, vector<8x8xf32> -> vector<8x8xf32>
    %c3_123 = arith.constant 3 : index
    %c0_124 = arith.constant 0 : index
    %c0_125 = arith.constant 0 : index
    %168 = vector.load %arg10[%c3_123, %c0_124, %c0_125] : memref<8x1x8xf32, #tpu.memory_space<vmem>>, vector<1x1x8xf32>
    %169 = vector.shape_cast %168 : vector<1x1x8xf32> to vector<1x8xf32>
    %170 = vector.broadcast %169 : vector<1x8xf32> to vector<8x8xf32>
    %171 = arith.addf %167, %170 : vector<8x8xf32>
    %c3_126 = arith.constant 3 : index
    %c0_127 = arith.constant 0 : index
    %c0_128 = arith.constant 0 : index
    %172 = vector.load %arg11[%c3_126, %c0_127, %c0_128] : memref<8x32x8xf32, #tpu.memory_space<vmem>>, vector<1x32x8xf32>
    %173 = vector.shape_cast %172 : vector<1x32x8xf32> to vector<32x8xf32>
    %cst_129 = arith.constant dense<0.000000e+00> : vector<8x8xf32>
    %174 = tpu.matmul %33, %173, %cst_129 {dimension_numbers = #tpu.dot_dimension_numbers<[1], [0], [0], [1], [0, 0, 1, 1], [], []>} : vector<8x32xf32>, vector<32x8xf32>, vector<8x8xf32> -> vector<8x8xf32>
    %c3_130 = arith.constant 3 : index
    %c0_131 = arith.constant 0 : index
    %c0_132 = arith.constant 0 : index
    %175 = vector.load %arg12[%c3_130, %c0_131, %c0_132] : memref<8x1x8xf32, #tpu.memory_space<vmem>>, vector<1x1x8xf32>
    %176 = vector.shape_cast %175 : vector<1x1x8xf32> to vector<1x8xf32>
    %177 = vector.broadcast %176 : vector<1x8xf32> to vector<8x8xf32>
    %178 = arith.addf %174, %177 : vector<8x8xf32>
    %cst_133 = arith.constant dense<0.000000e+00> : vector<8x8xf32>
    %179 = tpu.matmul %164, %171, %cst_133 {dimension_numbers = #tpu.dot_dimension_numbers<[1], [1], [0], [0], [0, 0, 1, 0], [], []>} : vector<8x8xf32>, vector<8x8xf32>, vector<8x8xf32> -> vector<8x8xf32>
    %cst_134 = arith.constant 0.000000e+00 : f32
    %180 = vector.broadcast %cst_134 : f32 to vector<8x8xf32>
    %181 = arith.cmpf oeq, %5, %180 : vector<8x8xf32>
    %cst_135 = arith.constant -1.000000e+04 : f32
    %182 = vector.broadcast %cst_135 : f32 to vector<8x8xf32>
    %183 = arith.select %181, %182, %179 : vector<8x8xi1>, vector<8x8xf32>
    %cst_136 = arith.constant dense<0xFF800000> : vector<8xf32>
    %184 = vector.multi_reduction <maximumf>, %183, %cst_136 [1] : vector<8x8xf32> to vector<8xf32>
    %185 = vector.shape_cast %184 : vector<8xf32> to vector<8x1xf32>
    %186 = vector.broadcast %185 : vector<8x1xf32> to vector<8x8xf32>
    %187 = arith.subf %183, %186 : vector<8x8xf32>
    %188 = math.exp %187 : vector<8x8xf32>
    %cst_137 = arith.constant dense<0.000000e+00> : vector<8xf32>
    %189 = vector.multi_reduction <add>, %188, %cst_137 [1] : vector<8x8xf32> to vector<8xf32>
    %190 = vector.shape_cast %189 : vector<8xf32> to vector<8x1xf32>
    %191 = tpu.reciprocal %190 {approx = true} : vector<8x1xf32> -> vector<8x1xf32>
    %192 = vector.broadcast %191 : vector<8x1xf32> to vector<8x8xf32>
    %193 = arith.mulf %188, %192 : vector<8x8xf32>
    %cst_138 = arith.constant dense<0.000000e+00> : vector<8x8xf32>
    %194 = tpu.matmul %193, %178, %cst_138 {dimension_numbers = #tpu.dot_dimension_numbers<[1], [0], [0], [1], [0, 0, 1, 1], [], []>} : vector<8x8xf32>, vector<8x8xf32>, vector<8x8xf32> -> vector<8x8xf32>
    %c3_139 = arith.constant 3 : index
    %c0_140 = arith.constant 0 : index
    %c0_141 = arith.constant 0 : index
    %195 = vector.load %arg13[%c3_139, %c0_140, %c0_141] : memref<8x8x32xf32, #tpu.memory_space<vmem>>, vector<1x8x32xf32>
    %196 = vector.shape_cast %195 : vector<1x8x32xf32> to vector<8x32xf32>
    %cst_142 = arith.constant dense<0.000000e+00> : vector<8x32xf32>
    %197 = tpu.matmul %194, %196, %cst_142 {dimension_numbers = #tpu.dot_dimension_numbers<[1], [0], [0], [1], [0, 0, 1, 1], [], []>} : vector<8x8xf32>, vector<8x32xf32>, vector<8x32xf32> -> vector<8x32xf32>
    %198 = arith.addf %157, %197 : vector<8x32xf32>
    %c0_143 = arith.constant 0 : index
    %c0_144 = arith.constant 0 : index
    %c0_145 = arith.constant 0 : index
    %199 = vector.load %arg14[%c0_143, %c0_144, %c0_145] : memref<2x1x32xf32, #tpu.memory_space<vmem>>, vector<1x1x32xf32>
    %200 = vector.shape_cast %199 : vector<1x1x32xf32> to vector<1x32xf32>
    %201 = vector.broadcast %200 : vector<1x32xf32> to vector<8x32xf32>
    %202 = arith.addf %198, %201 : vector<8x32xf32>
    %203 = arith.addf %1, %202 : vector<8x32xf32>
    %cst_146 = arith.constant dense<0.000000e+00> : vector<8xf32>
    %204 = vector.multi_reduction <add>, %203, %cst_146 [1] : vector<8x32xf32> to vector<8xf32>
    %205 = vector.shape_cast %204 : vector<8xf32> to vector<8x1xf32>
    %cst_147 = arith.constant 3.200000e+01 : f32
    %206 = vector.broadcast %cst_147 : f32 to vector<8x1xf32>
    %207 = arith.divf %205, %206 : vector<8x1xf32>
    %208 = vector.broadcast %207 : vector<8x1xf32> to vector<8x32xf32>
    %209 = arith.subf %203, %208 : vector<8x32xf32>
    %210 = arith.mulf %209, %209 : vector<8x32xf32>
    %cst_148 = arith.constant dense<0.000000e+00> : vector<8xf32>
    %211 = vector.multi_reduction <add>, %210, %cst_148 [1] : vector<8x32xf32> to vector<8xf32>
    %212 = vector.shape_cast %211 : vector<8xf32> to vector<8x1xf32>
    %cst_149 = arith.constant 3.200000e+01 : f32
    %213 = vector.broadcast %cst_149 : f32 to vector<8x1xf32>
    %214 = arith.divf %212, %213 : vector<8x1xf32>
    %215 = vector.broadcast %207 : vector<8x1xf32> to vector<8x32xf32>
    %216 = arith.subf %203, %215 : vector<8x32xf32>
    %cst_150 = arith.constant 9.99999974E-6 : f32
    %217 = vector.broadcast %cst_150 : f32 to vector<8x1xf32>
    %218 = arith.addf %214, %217 : vector<8x1xf32>
    %219 = math.rsqrt %218 : vector<8x1xf32>
    %220 = vector.broadcast %219 : vector<8x1xf32> to vector<8x32xf32>
    %221 = arith.mulf %216, %220 : vector<8x32xf32>
    %c1_151 = arith.constant 1 : index
    %c0_152 = arith.constant 0 : index
    %c0_153 = arith.constant 0 : index
    %222 = vector.load %arg5[%c1_151, %c0_152, %c0_153] : memref<3x1x32xf32, #tpu.memory_space<vmem>>, vector<1x1x32xf32>
    %223 = vector.shape_cast %222 : vector<1x1x32xf32> to vector<1x32xf32>
    %224 = vector.broadcast %223 : vector<1x32xf32> to vector<8x32xf32>
    %225 = arith.mulf %221, %224 : vector<8x32xf32>
    %c1_154 = arith.constant 1 : index
    %c0_155 = arith.constant 0 : index
    %c0_156 = arith.constant 0 : index
    %226 = vector.load %arg6[%c1_154, %c0_155, %c0_156] : memref<3x1x32xf32, #tpu.memory_space<vmem>>, vector<1x1x32xf32>
    %227 = vector.shape_cast %226 : vector<1x1x32xf32> to vector<1x32xf32>
    %228 = vector.broadcast %227 : vector<1x32xf32> to vector<8x32xf32>
    %229 = arith.addf %225, %228 : vector<8x32xf32>
    %cst_157 = arith.constant 0.000000e+00 : f32
    %230 = vector.broadcast %cst_157 : f32 to vector<8x32xf32>
    %c4 = arith.constant 4 : index
    %c0_158 = arith.constant 0 : index
    %c0_159 = arith.constant 0 : index
    %231 = vector.load %arg7[%c4, %c0_158, %c0_159] : memref<8x32x8xf32, #tpu.memory_space<vmem>>, vector<1x32x8xf32>
    %232 = vector.shape_cast %231 : vector<1x32x8xf32> to vector<32x8xf32>
    %cst_160 = arith.constant dense<0.000000e+00> : vector<8x8xf32>
    %233 = tpu.matmul %229, %232, %cst_160 {dimension_numbers = #tpu.dot_dimension_numbers<[1], [0], [0], [1], [0, 0, 1, 1], [], []>} : vector<8x32xf32>, vector<32x8xf32>, vector<8x8xf32> -> vector<8x8xf32>
    %c4_161 = arith.constant 4 : index
    %c0_162 = arith.constant 0 : index
    %c0_163 = arith.constant 0 : index
    %234 = vector.load %arg8[%c4_161, %c0_162, %c0_163] : memref<8x1x8xf32, #tpu.memory_space<vmem>>, vector<1x1x8xf32>
    %235 = vector.shape_cast %234 : vector<1x1x8xf32> to vector<1x8xf32>
    %236 = vector.broadcast %235 : vector<1x8xf32> to vector<8x8xf32>
    %237 = arith.addf %233, %236 : vector<8x8xf32>
    %c4_164 = arith.constant 4 : index
    %c0_165 = arith.constant 0 : index
    %c0_166 = arith.constant 0 : index
    %238 = vector.load %arg9[%c4_164, %c0_165, %c0_166] : memref<8x32x8xf32, #tpu.memory_space<vmem>>, vector<1x32x8xf32>
    %239 = vector.shape_cast %238 : vector<1x32x8xf32> to vector<32x8xf32>
    %cst_167 = arith.constant dense<0.000000e+00> : vector<8x8xf32>
    %240 = tpu.matmul %3, %239, %cst_167 {dimension_numbers = #tpu.dot_dimension_numbers<[1], [0], [0], [1], [0, 0, 1, 1], [], []>} : vector<8x32xf32>, vector<32x8xf32>, vector<8x8xf32> -> vector<8x8xf32>
    %c4_168 = arith.constant 4 : index
    %c0_169 = arith.constant 0 : index
    %c0_170 = arith.constant 0 : index
    %241 = vector.load %arg10[%c4_168, %c0_169, %c0_170] : memref<8x1x8xf32, #tpu.memory_space<vmem>>, vector<1x1x8xf32>
    %242 = vector.shape_cast %241 : vector<1x1x8xf32> to vector<1x8xf32>
    %243 = vector.broadcast %242 : vector<1x8xf32> to vector<8x8xf32>
    %244 = arith.addf %240, %243 : vector<8x8xf32>
    %c4_171 = arith.constant 4 : index
    %c0_172 = arith.constant 0 : index
    %c0_173 = arith.constant 0 : index
    %245 = vector.load %arg11[%c4_171, %c0_172, %c0_173] : memref<8x32x8xf32, #tpu.memory_space<vmem>>, vector<1x32x8xf32>
    %246 = vector.shape_cast %245 : vector<1x32x8xf32> to vector<32x8xf32>
    %cst_174 = arith.constant dense<0.000000e+00> : vector<8x8xf32>
    %247 = tpu.matmul %3, %246, %cst_174 {dimension_numbers = #tpu.dot_dimension_numbers<[1], [0], [0], [1], [0, 0, 1, 1], [], []>} : vector<8x32xf32>, vector<32x8xf32>, vector<8x8xf32> -> vector<8x8xf32>
    %c4_175 = arith.constant 4 : index
    %c0_176 = arith.constant 0 : index
    %c0_177 = arith.constant 0 : index
    %248 = vector.load %arg12[%c4_175, %c0_176, %c0_177] : memref<8x1x8xf32, #tpu.memory_space<vmem>>, vector<1x1x8xf32>
    %249 = vector.shape_cast %248 : vector<1x1x8xf32> to vector<1x8xf32>
    %250 = vector.broadcast %249 : vector<1x8xf32> to vector<8x8xf32>
    %251 = arith.addf %247, %250 : vector<8x8xf32>
    %cst_178 = arith.constant dense<0.000000e+00> : vector<8x8xf32>
    %252 = tpu.matmul %237, %244, %cst_178 {dimension_numbers = #tpu.dot_dimension_numbers<[1], [1], [0], [0], [0, 0, 1, 0], [], []>} : vector<8x8xf32>, vector<8x8xf32>, vector<8x8xf32> -> vector<8x8xf32>
    %cst_179 = arith.constant 0.000000e+00 : f32
    %253 = vector.broadcast %cst_179 : f32 to vector<8x8xf32>
    %254 = arith.cmpf oeq, %7, %253 : vector<8x8xf32>
    %cst_180 = arith.constant -1.000000e+04 : f32
    %255 = vector.broadcast %cst_180 : f32 to vector<8x8xf32>
    %256 = arith.select %254, %255, %252 : vector<8x8xi1>, vector<8x8xf32>
    %cst_181 = arith.constant dense<0xFF800000> : vector<8xf32>
    %257 = vector.multi_reduction <maximumf>, %256, %cst_181 [1] : vector<8x8xf32> to vector<8xf32>
    %258 = vector.shape_cast %257 : vector<8xf32> to vector<8x1xf32>
    %259 = vector.broadcast %258 : vector<8x1xf32> to vector<8x8xf32>
    %260 = arith.subf %256, %259 : vector<8x8xf32>
    %261 = math.exp %260 : vector<8x8xf32>
    %cst_182 = arith.constant dense<0.000000e+00> : vector<8xf32>
    %262 = vector.multi_reduction <add>, %261, %cst_182 [1] : vector<8x8xf32> to vector<8xf32>
    %263 = vector.shape_cast %262 : vector<8xf32> to vector<8x1xf32>
    %264 = tpu.reciprocal %263 {approx = true} : vector<8x1xf32> -> vector<8x1xf32>
    %265 = vector.broadcast %264 : vector<8x1xf32> to vector<8x8xf32>
    %266 = arith.mulf %261, %265 : vector<8x8xf32>
    %cst_183 = arith.constant dense<0.000000e+00> : vector<8x8xf32>
    %267 = tpu.matmul %266, %251, %cst_183 {dimension_numbers = #tpu.dot_dimension_numbers<[1], [0], [0], [1], [0, 0, 1, 1], [], []>} : vector<8x8xf32>, vector<8x8xf32>, vector<8x8xf32> -> vector<8x8xf32>
    %c4_184 = arith.constant 4 : index
    %c0_185 = arith.constant 0 : index
    %c0_186 = arith.constant 0 : index
    %268 = vector.load %arg13[%c4_184, %c0_185, %c0_186] : memref<8x8x32xf32, #tpu.memory_space<vmem>>, vector<1x8x32xf32>
    %269 = vector.shape_cast %268 : vector<1x8x32xf32> to vector<8x32xf32>
    %cst_187 = arith.constant dense<0.000000e+00> : vector<8x32xf32>
    %270 = tpu.matmul %267, %269, %cst_187 {dimension_numbers = #tpu.dot_dimension_numbers<[1], [0], [0], [1], [0, 0, 1, 1], [], []>} : vector<8x8xf32>, vector<8x32xf32>, vector<8x32xf32> -> vector<8x32xf32>
    %271 = arith.addf %230, %270 : vector<8x32xf32>
    %c5 = arith.constant 5 : index
    %c0_188 = arith.constant 0 : index
    %c0_189 = arith.constant 0 : index
    %272 = vector.load %arg7[%c5, %c0_188, %c0_189] : memref<8x32x8xf32, #tpu.memory_space<vmem>>, vector<1x32x8xf32>
    %273 = vector.shape_cast %272 : vector<1x32x8xf32> to vector<32x8xf32>
    %cst_190 = arith.constant dense<0.000000e+00> : vector<8x8xf32>
    %274 = tpu.matmul %229, %273, %cst_190 {dimension_numbers = #tpu.dot_dimension_numbers<[1], [0], [0], [1], [0, 0, 1, 1], [], []>} : vector<8x32xf32>, vector<32x8xf32>, vector<8x8xf32> -> vector<8x8xf32>
    %c5_191 = arith.constant 5 : index
    %c0_192 = arith.constant 0 : index
    %c0_193 = arith.constant 0 : index
    %275 = vector.load %arg8[%c5_191, %c0_192, %c0_193] : memref<8x1x8xf32, #tpu.memory_space<vmem>>, vector<1x1x8xf32>
    %276 = vector.shape_cast %275 : vector<1x1x8xf32> to vector<1x8xf32>
    %277 = vector.broadcast %276 : vector<1x8xf32> to vector<8x8xf32>
    %278 = arith.addf %274, %277 : vector<8x8xf32>
    %c5_194 = arith.constant 5 : index
    %c0_195 = arith.constant 0 : index
    %c0_196 = arith.constant 0 : index
    %279 = vector.load %arg9[%c5_194, %c0_195, %c0_196] : memref<8x32x8xf32, #tpu.memory_space<vmem>>, vector<1x32x8xf32>
    %280 = vector.shape_cast %279 : vector<1x32x8xf32> to vector<32x8xf32>
    %cst_197 = arith.constant dense<0.000000e+00> : vector<8x8xf32>
    %281 = tpu.matmul %3, %280, %cst_197 {dimension_numbers = #tpu.dot_dimension_numbers<[1], [0], [0], [1], [0, 0, 1, 1], [], []>} : vector<8x32xf32>, vector<32x8xf32>, vector<8x8xf32> -> vector<8x8xf32>
    %c5_198 = arith.constant 5 : index
    %c0_199 = arith.constant 0 : index
    %c0_200 = arith.constant 0 : index
    %282 = vector.load %arg10[%c5_198, %c0_199, %c0_200] : memref<8x1x8xf32, #tpu.memory_space<vmem>>, vector<1x1x8xf32>
    %283 = vector.shape_cast %282 : vector<1x1x8xf32> to vector<1x8xf32>
    %284 = vector.broadcast %283 : vector<1x8xf32> to vector<8x8xf32>
    %285 = arith.addf %281, %284 : vector<8x8xf32>
    %c5_201 = arith.constant 5 : index
    %c0_202 = arith.constant 0 : index
    %c0_203 = arith.constant 0 : index
    %286 = vector.load %arg11[%c5_201, %c0_202, %c0_203] : memref<8x32x8xf32, #tpu.memory_space<vmem>>, vector<1x32x8xf32>
    %287 = vector.shape_cast %286 : vector<1x32x8xf32> to vector<32x8xf32>
    %cst_204 = arith.constant dense<0.000000e+00> : vector<8x8xf32>
    %288 = tpu.matmul %3, %287, %cst_204 {dimension_numbers = #tpu.dot_dimension_numbers<[1], [0], [0], [1], [0, 0, 1, 1], [], []>} : vector<8x32xf32>, vector<32x8xf32>, vector<8x8xf32> -> vector<8x8xf32>
    %c5_205 = arith.constant 5 : index
    %c0_206 = arith.constant 0 : index
    %c0_207 = arith.constant 0 : index
    %289 = vector.load %arg12[%c5_205, %c0_206, %c0_207] : memref<8x1x8xf32, #tpu.memory_space<vmem>>, vector<1x1x8xf32>
    %290 = vector.shape_cast %289 : vector<1x1x8xf32> to vector<1x8xf32>
    %291 = vector.broadcast %290 : vector<1x8xf32> to vector<8x8xf32>
    %292 = arith.addf %288, %291 : vector<8x8xf32>
    %cst_208 = arith.constant dense<0.000000e+00> : vector<8x8xf32>
    %293 = tpu.matmul %278, %285, %cst_208 {dimension_numbers = #tpu.dot_dimension_numbers<[1], [1], [0], [0], [0, 0, 1, 0], [], []>} : vector<8x8xf32>, vector<8x8xf32>, vector<8x8xf32> -> vector<8x8xf32>
    %cst_209 = arith.constant 0.000000e+00 : f32
    %294 = vector.broadcast %cst_209 : f32 to vector<8x8xf32>
    %295 = arith.cmpf oeq, %7, %294 : vector<8x8xf32>
    %cst_210 = arith.constant -1.000000e+04 : f32
    %296 = vector.broadcast %cst_210 : f32 to vector<8x8xf32>
    %297 = arith.select %295, %296, %293 : vector<8x8xi1>, vector<8x8xf32>
    %cst_211 = arith.constant dense<0xFF800000> : vector<8xf32>
    %298 = vector.multi_reduction <maximumf>, %297, %cst_211 [1] : vector<8x8xf32> to vector<8xf32>
    %299 = vector.shape_cast %298 : vector<8xf32> to vector<8x1xf32>
    %300 = vector.broadcast %299 : vector<8x1xf32> to vector<8x8xf32>
    %301 = arith.subf %297, %300 : vector<8x8xf32>
    %302 = math.exp %301 : vector<8x8xf32>
    %cst_212 = arith.constant dense<0.000000e+00> : vector<8xf32>
    %303 = vector.multi_reduction <add>, %302, %cst_212 [1] : vector<8x8xf32> to vector<8xf32>
    %304 = vector.shape_cast %303 : vector<8xf32> to vector<8x1xf32>
    %305 = tpu.reciprocal %304 {approx = true} : vector<8x1xf32> -> vector<8x1xf32>
    %306 = vector.broadcast %305 : vector<8x1xf32> to vector<8x8xf32>
    %307 = arith.mulf %302, %306 : vector<8x8xf32>
    %cst_213 = arith.constant dense<0.000000e+00> : vector<8x8xf32>
    %308 = tpu.matmul %307, %292, %cst_213 {dimension_numbers = #tpu.dot_dimension_numbers<[1], [0], [0], [1], [0, 0, 1, 1], [], []>} : vector<8x8xf32>, vector<8x8xf32>, vector<8x8xf32> -> vector<8x8xf32>
    %c5_214 = arith.constant 5 : index
    %c0_215 = arith.constant 0 : index
    %c0_216 = arith.constant 0 : index
    %309 = vector.load %arg13[%c5_214, %c0_215, %c0_216] : memref<8x8x32xf32, #tpu.memory_space<vmem>>, vector<1x8x32xf32>
    %310 = vector.shape_cast %309 : vector<1x8x32xf32> to vector<8x32xf32>
    %cst_217 = arith.constant dense<0.000000e+00> : vector<8x32xf32>
    %311 = tpu.matmul %308, %310, %cst_217 {dimension_numbers = #tpu.dot_dimension_numbers<[1], [0], [0], [1], [0, 0, 1, 1], [], []>} : vector<8x8xf32>, vector<8x32xf32>, vector<8x32xf32> -> vector<8x32xf32>
    %312 = arith.addf %271, %311 : vector<8x32xf32>
    %c6 = arith.constant 6 : index
    %c0_218 = arith.constant 0 : index
    %c0_219 = arith.constant 0 : index
    %313 = vector.load %arg7[%c6, %c0_218, %c0_219] : memref<8x32x8xf32, #tpu.memory_space<vmem>>, vector<1x32x8xf32>
    %314 = vector.shape_cast %313 : vector<1x32x8xf32> to vector<32x8xf32>
    %cst_220 = arith.constant dense<0.000000e+00> : vector<8x8xf32>
    %315 = tpu.matmul %229, %314, %cst_220 {dimension_numbers = #tpu.dot_dimension_numbers<[1], [0], [0], [1], [0, 0, 1, 1], [], []>} : vector<8x32xf32>, vector<32x8xf32>, vector<8x8xf32> -> vector<8x8xf32>
    %c6_221 = arith.constant 6 : index
    %c0_222 = arith.constant 0 : index
    %c0_223 = arith.constant 0 : index
    %316 = vector.load %arg8[%c6_221, %c0_222, %c0_223] : memref<8x1x8xf32, #tpu.memory_space<vmem>>, vector<1x1x8xf32>
    %317 = vector.shape_cast %316 : vector<1x1x8xf32> to vector<1x8xf32>
    %318 = vector.broadcast %317 : vector<1x8xf32> to vector<8x8xf32>
    %319 = arith.addf %315, %318 : vector<8x8xf32>
    %c6_224 = arith.constant 6 : index
    %c0_225 = arith.constant 0 : index
    %c0_226 = arith.constant 0 : index
    %320 = vector.load %arg9[%c6_224, %c0_225, %c0_226] : memref<8x32x8xf32, #tpu.memory_space<vmem>>, vector<1x32x8xf32>
    %321 = vector.shape_cast %320 : vector<1x32x8xf32> to vector<32x8xf32>
    %cst_227 = arith.constant dense<0.000000e+00> : vector<8x8xf32>
    %322 = tpu.matmul %3, %321, %cst_227 {dimension_numbers = #tpu.dot_dimension_numbers<[1], [0], [0], [1], [0, 0, 1, 1], [], []>} : vector<8x32xf32>, vector<32x8xf32>, vector<8x8xf32> -> vector<8x8xf32>
    %c6_228 = arith.constant 6 : index
    %c0_229 = arith.constant 0 : index
    %c0_230 = arith.constant 0 : index
    %323 = vector.load %arg10[%c6_228, %c0_229, %c0_230] : memref<8x1x8xf32, #tpu.memory_space<vmem>>, vector<1x1x8xf32>
    %324 = vector.shape_cast %323 : vector<1x1x8xf32> to vector<1x8xf32>
    %325 = vector.broadcast %324 : vector<1x8xf32> to vector<8x8xf32>
    %326 = arith.addf %322, %325 : vector<8x8xf32>
    %c6_231 = arith.constant 6 : index
    %c0_232 = arith.constant 0 : index
    %c0_233 = arith.constant 0 : index
    %327 = vector.load %arg11[%c6_231, %c0_232, %c0_233] : memref<8x32x8xf32, #tpu.memory_space<vmem>>, vector<1x32x8xf32>
    %328 = vector.shape_cast %327 : vector<1x32x8xf32> to vector<32x8xf32>
    %cst_234 = arith.constant dense<0.000000e+00> : vector<8x8xf32>
    %329 = tpu.matmul %3, %328, %cst_234 {dimension_numbers = #tpu.dot_dimension_numbers<[1], [0], [0], [1], [0, 0, 1, 1], [], []>} : vector<8x32xf32>, vector<32x8xf32>, vector<8x8xf32> -> vector<8x8xf32>
    %c6_235 = arith.constant 6 : index
    %c0_236 = arith.constant 0 : index
    %c0_237 = arith.constant 0 : index
    %330 = vector.load %arg12[%c6_235, %c0_236, %c0_237] : memref<8x1x8xf32, #tpu.memory_space<vmem>>, vector<1x1x8xf32>
    %331 = vector.shape_cast %330 : vector<1x1x8xf32> to vector<1x8xf32>
    %332 = vector.broadcast %331 : vector<1x8xf32> to vector<8x8xf32>
    %333 = arith.addf %329, %332 : vector<8x8xf32>
    %cst_238 = arith.constant dense<0.000000e+00> : vector<8x8xf32>
    %334 = tpu.matmul %319, %326, %cst_238 {dimension_numbers = #tpu.dot_dimension_numbers<[1], [1], [0], [0], [0, 0, 1, 0], [], []>} : vector<8x8xf32>, vector<8x8xf32>, vector<8x8xf32> -> vector<8x8xf32>
    %cst_239 = arith.constant 0.000000e+00 : f32
    %335 = vector.broadcast %cst_239 : f32 to vector<8x8xf32>
    %336 = arith.cmpf oeq, %7, %335 : vector<8x8xf32>
    %cst_240 = arith.constant -1.000000e+04 : f32
    %337 = vector.broadcast %cst_240 : f32 to vector<8x8xf32>
    %338 = arith.select %336, %337, %334 : vector<8x8xi1>, vector<8x8xf32>
    %cst_241 = arith.constant dense<0xFF800000> : vector<8xf32>
    %339 = vector.multi_reduction <maximumf>, %338, %cst_241 [1] : vector<8x8xf32> to vector<8xf32>
    %340 = vector.shape_cast %339 : vector<8xf32> to vector<8x1xf32>
    %341 = vector.broadcast %340 : vector<8x1xf32> to vector<8x8xf32>
    %342 = arith.subf %338, %341 : vector<8x8xf32>
    %343 = math.exp %342 : vector<8x8xf32>
    %cst_242 = arith.constant dense<0.000000e+00> : vector<8xf32>
    %344 = vector.multi_reduction <add>, %343, %cst_242 [1] : vector<8x8xf32> to vector<8xf32>
    %345 = vector.shape_cast %344 : vector<8xf32> to vector<8x1xf32>
    %346 = tpu.reciprocal %345 {approx = true} : vector<8x1xf32> -> vector<8x1xf32>
    %347 = vector.broadcast %346 : vector<8x1xf32> to vector<8x8xf32>
    %348 = arith.mulf %343, %347 : vector<8x8xf32>
    %cst_243 = arith.constant dense<0.000000e+00> : vector<8x8xf32>
    %349 = tpu.matmul %348, %333, %cst_243 {dimension_numbers = #tpu.dot_dimension_numbers<[1], [0], [0], [1], [0, 0, 1, 1], [], []>} : vector<8x8xf32>, vector<8x8xf32>, vector<8x8xf32> -> vector<8x8xf32>
    %c6_244 = arith.constant 6 : index
    %c0_245 = arith.constant 0 : index
    %c0_246 = arith.constant 0 : index
    %350 = vector.load %arg13[%c6_244, %c0_245, %c0_246] : memref<8x8x32xf32, #tpu.memory_space<vmem>>, vector<1x8x32xf32>
    %351 = vector.shape_cast %350 : vector<1x8x32xf32> to vector<8x32xf32>
    %cst_247 = arith.constant dense<0.000000e+00> : vector<8x32xf32>
    %352 = tpu.matmul %349, %351, %cst_247 {dimension_numbers = #tpu.dot_dimension_numbers<[1], [0], [0], [1], [0, 0, 1, 1], [], []>} : vector<8x8xf32>, vector<8x32xf32>, vector<8x32xf32> -> vector<8x32xf32>
    %353 = arith.addf %312, %352 : vector<8x32xf32>
    %c7 = arith.constant 7 : index
    %c0_248 = arith.constant 0 : index
    %c0_249 = arith.constant 0 : index
    %354 = vector.load %arg7[%c7, %c0_248, %c0_249] : memref<8x32x8xf32, #tpu.memory_space<vmem>>, vector<1x32x8xf32>
    %355 = vector.shape_cast %354 : vector<1x32x8xf32> to vector<32x8xf32>
    %cst_250 = arith.constant dense<0.000000e+00> : vector<8x8xf32>
    %356 = tpu.matmul %229, %355, %cst_250 {dimension_numbers = #tpu.dot_dimension_numbers<[1], [0], [0], [1], [0, 0, 1, 1], [], []>} : vector<8x32xf32>, vector<32x8xf32>, vector<8x8xf32> -> vector<8x8xf32>
    %c7_251 = arith.constant 7 : index
    %c0_252 = arith.constant 0 : index
    %c0_253 = arith.constant 0 : index
    %357 = vector.load %arg8[%c7_251, %c0_252, %c0_253] : memref<8x1x8xf32, #tpu.memory_space<vmem>>, vector<1x1x8xf32>
    %358 = vector.shape_cast %357 : vector<1x1x8xf32> to vector<1x8xf32>
    %359 = vector.broadcast %358 : vector<1x8xf32> to vector<8x8xf32>
    %360 = arith.addf %356, %359 : vector<8x8xf32>
    %c7_254 = arith.constant 7 : index
    %c0_255 = arith.constant 0 : index
    %c0_256 = arith.constant 0 : index
    %361 = vector.load %arg9[%c7_254, %c0_255, %c0_256] : memref<8x32x8xf32, #tpu.memory_space<vmem>>, vector<1x32x8xf32>
    %362 = vector.shape_cast %361 : vector<1x32x8xf32> to vector<32x8xf32>
    %cst_257 = arith.constant dense<0.000000e+00> : vector<8x8xf32>
    %363 = tpu.matmul %3, %362, %cst_257 {dimension_numbers = #tpu.dot_dimension_numbers<[1], [0], [0], [1], [0, 0, 1, 1], [], []>} : vector<8x32xf32>, vector<32x8xf32>, vector<8x8xf32> -> vector<8x8xf32>
    %c7_258 = arith.constant 7 : index
    %c0_259 = arith.constant 0 : index
    %c0_260 = arith.constant 0 : index
    %364 = vector.load %arg10[%c7_258, %c0_259, %c0_260] : memref<8x1x8xf32, #tpu.memory_space<vmem>>, vector<1x1x8xf32>
    %365 = vector.shape_cast %364 : vector<1x1x8xf32> to vector<1x8xf32>
    %366 = vector.broadcast %365 : vector<1x8xf32> to vector<8x8xf32>
    %367 = arith.addf %363, %366 : vector<8x8xf32>
    %c7_261 = arith.constant 7 : index
    %c0_262 = arith.constant 0 : index
    %c0_263 = arith.constant 0 : index
    %368 = vector.load %arg11[%c7_261, %c0_262, %c0_263] : memref<8x32x8xf32, #tpu.memory_space<vmem>>, vector<1x32x8xf32>
    %369 = vector.shape_cast %368 : vector<1x32x8xf32> to vector<32x8xf32>
    %cst_264 = arith.constant dense<0.000000e+00> : vector<8x8xf32>
    %370 = tpu.matmul %3, %369, %cst_264 {dimension_numbers = #tpu.dot_dimension_numbers<[1], [0], [0], [1], [0, 0, 1, 1], [], []>} : vector<8x32xf32>, vector<32x8xf32>, vector<8x8xf32> -> vector<8x8xf32>
    %c7_265 = arith.constant 7 : index
    %c0_266 = arith.constant 0 : index
    %c0_267 = arith.constant 0 : index
    %371 = vector.load %arg12[%c7_265, %c0_266, %c0_267] : memref<8x1x8xf32, #tpu.memory_space<vmem>>, vector<1x1x8xf32>
    %372 = vector.shape_cast %371 : vector<1x1x8xf32> to vector<1x8xf32>
    %373 = vector.broadcast %372 : vector<1x8xf32> to vector<8x8xf32>
    %374 = arith.addf %370, %373 : vector<8x8xf32>
    %cst_268 = arith.constant dense<0.000000e+00> : vector<8x8xf32>
    %375 = tpu.matmul %360, %367, %cst_268 {dimension_numbers = #tpu.dot_dimension_numbers<[1], [1], [0], [0], [0, 0, 1, 0], [], []>} : vector<8x8xf32>, vector<8x8xf32>, vector<8x8xf32> -> vector<8x8xf32>
    %cst_269 = arith.constant 0.000000e+00 : f32
    %376 = vector.broadcast %cst_269 : f32 to vector<8x8xf32>
    %377 = arith.cmpf oeq, %7, %376 : vector<8x8xf32>
    %cst_270 = arith.constant -1.000000e+04 : f32
    %378 = vector.broadcast %cst_270 : f32 to vector<8x8xf32>
    %379 = arith.select %377, %378, %375 : vector<8x8xi1>, vector<8x8xf32>
    %cst_271 = arith.constant dense<0xFF800000> : vector<8xf32>
    %380 = vector.multi_reduction <maximumf>, %379, %cst_271 [1] : vector<8x8xf32> to vector<8xf32>
    %381 = vector.shape_cast %380 : vector<8xf32> to vector<8x1xf32>
    %382 = vector.broadcast %381 : vector<8x1xf32> to vector<8x8xf32>
    %383 = arith.subf %379, %382 : vector<8x8xf32>
    %384 = math.exp %383 : vector<8x8xf32>
    %cst_272 = arith.constant dense<0.000000e+00> : vector<8xf32>
    %385 = vector.multi_reduction <add>, %384, %cst_272 [1] : vector<8x8xf32> to vector<8xf32>
    %386 = vector.shape_cast %385 : vector<8xf32> to vector<8x1xf32>
    %387 = tpu.reciprocal %386 {approx = true} : vector<8x1xf32> -> vector<8x1xf32>
    %388 = vector.broadcast %387 : vector<8x1xf32> to vector<8x8xf32>
    %389 = arith.mulf %384, %388 : vector<8x8xf32>
    %cst_273 = arith.constant dense<0.000000e+00> : vector<8x8xf32>
    %390 = tpu.matmul %389, %374, %cst_273 {dimension_numbers = #tpu.dot_dimension_numbers<[1], [0], [0], [1], [0, 0, 1, 1], [], []>} : vector<8x8xf32>, vector<8x8xf32>, vector<8x8xf32> -> vector<8x8xf32>
    %c7_274 = arith.constant 7 : index
    %c0_275 = arith.constant 0 : index
    %c0_276 = arith.constant 0 : index
    %391 = vector.load %arg13[%c7_274, %c0_275, %c0_276] : memref<8x8x32xf32, #tpu.memory_space<vmem>>, vector<1x8x32xf32>
    %392 = vector.shape_cast %391 : vector<1x8x32xf32> to vector<8x32xf32>
    %cst_277 = arith.constant dense<0.000000e+00> : vector<8x32xf32>
    %393 = tpu.matmul %390, %392, %cst_277 {dimension_numbers = #tpu.dot_dimension_numbers<[1], [0], [0], [1], [0, 0, 1, 1], [], []>} : vector<8x8xf32>, vector<8x32xf32>, vector<8x32xf32> -> vector<8x32xf32>
    %394 = arith.addf %353, %393 : vector<8x32xf32>
    %c1_278 = arith.constant 1 : index
    %c0_279 = arith.constant 0 : index
    %c0_280 = arith.constant 0 : index
    %395 = vector.load %arg14[%c1_278, %c0_279, %c0_280] : memref<2x1x32xf32, #tpu.memory_space<vmem>>, vector<1x1x32xf32>
    %396 = vector.shape_cast %395 : vector<1x1x32xf32> to vector<1x32xf32>
    %397 = vector.broadcast %396 : vector<1x32xf32> to vector<8x32xf32>
    %398 = arith.addf %394, %397 : vector<8x32xf32>
    %399 = arith.addf %203, %398 : vector<8x32xf32>
    %cst_281 = arith.constant dense<0.000000e+00> : vector<8xf32>
    %400 = vector.multi_reduction <add>, %399, %cst_281 [1] : vector<8x32xf32> to vector<8xf32>
    %401 = vector.shape_cast %400 : vector<8xf32> to vector<8x1xf32>
    %cst_282 = arith.constant 3.200000e+01 : f32
    %402 = vector.broadcast %cst_282 : f32 to vector<8x1xf32>
    %403 = arith.divf %401, %402 : vector<8x1xf32>
    %404 = vector.broadcast %403 : vector<8x1xf32> to vector<8x32xf32>
    %405 = arith.subf %399, %404 : vector<8x32xf32>
    %406 = arith.mulf %405, %405 : vector<8x32xf32>
    %cst_283 = arith.constant dense<0.000000e+00> : vector<8xf32>
    %407 = vector.multi_reduction <add>, %406, %cst_283 [1] : vector<8x32xf32> to vector<8xf32>
    %408 = vector.shape_cast %407 : vector<8xf32> to vector<8x1xf32>
    %cst_284 = arith.constant 3.200000e+01 : f32
    %409 = vector.broadcast %cst_284 : f32 to vector<8x1xf32>
    %410 = arith.divf %408, %409 : vector<8x1xf32>
    %411 = vector.broadcast %403 : vector<8x1xf32> to vector<8x32xf32>
    %412 = arith.subf %399, %411 : vector<8x32xf32>
    %cst_285 = arith.constant 9.99999974E-6 : f32
    %413 = vector.broadcast %cst_285 : f32 to vector<8x1xf32>
    %414 = arith.addf %410, %413 : vector<8x1xf32>
    %415 = math.rsqrt %414 : vector<8x1xf32>
    %416 = vector.broadcast %415 : vector<8x1xf32> to vector<8x32xf32>
    %417 = arith.mulf %412, %416 : vector<8x32xf32>
    %c2_286 = arith.constant 2 : index
    %c0_287 = arith.constant 0 : index
    %c0_288 = arith.constant 0 : index
    %418 = vector.load %arg5[%c2_286, %c0_287, %c0_288] : memref<3x1x32xf32, #tpu.memory_space<vmem>>, vector<1x1x32xf32>
    %419 = vector.shape_cast %418 : vector<1x1x32xf32> to vector<1x32xf32>
    %420 = vector.broadcast %419 : vector<1x32xf32> to vector<8x32xf32>
    %421 = arith.mulf %417, %420 : vector<8x32xf32>
    %c2_289 = arith.constant 2 : index
    %c0_290 = arith.constant 0 : index
    %c0_291 = arith.constant 0 : index
    %422 = vector.load %arg6[%c2_289, %c0_290, %c0_291] : memref<3x1x32xf32, #tpu.memory_space<vmem>>, vector<1x1x32xf32>
    %423 = vector.shape_cast %422 : vector<1x1x32xf32> to vector<1x32xf32>
    %424 = vector.broadcast %423 : vector<1x32xf32> to vector<8x32xf32>
    %425 = arith.addf %421, %424 : vector<8x32xf32>
    %c0_292 = arith.constant 0 : index
    %c0_293 = arith.constant 0 : index
    %426 = vector.load %arg15[%c0_292, %c0_293] : memref<32x64xf32, #tpu.memory_space<vmem>>, vector<32x64xf32>
    %cst_294 = arith.constant dense<0.000000e+00> : vector<8x64xf32>
    %427 = tpu.matmul %425, %426, %cst_294 {dimension_numbers = #tpu.dot_dimension_numbers<[1], [0], [0], [1], [0, 0, 1, 1], [], []>} : vector<8x32xf32>, vector<32x64xf32>, vector<8x64xf32> -> vector<8x64xf32>
    %c0_295 = arith.constant 0 : index
    %c0_296 = arith.constant 0 : index
    %428 = vector.load %arg16[%c0_295, %c0_296] : memref<1x64xf32, #tpu.memory_space<vmem>>, vector<1x64xf32>
    %429 = vector.broadcast %428 : vector<1x64xf32> to vector<8x64xf32>
    %430 = arith.addf %427, %429 : vector<8x64xf32>
    %cst_297 = arith.constant 5.000000e-01 : f32
    %431 = vector.broadcast %cst_297 : f32 to vector<8x64xf32>
    %432 = arith.mulf %431, %430 : vector<8x64xf32>
    %cst_298 = arith.constant 0.707106769 : f32
    %433 = vector.broadcast %cst_298 : f32 to vector<8x64xf32>
    %434 = arith.mulf %430, %433 : vector<8x64xf32>
    %435 = math.erf %434 : vector<8x64xf32>
    %cst_299 = arith.constant 1.000000e+00 : f32
    %436 = vector.broadcast %cst_299 : f32 to vector<8x64xf32>
    %437 = arith.addf %436, %435 : vector<8x64xf32>
    %438 = arith.mulf %432, %437 : vector<8x64xf32>
    %c0_300 = arith.constant 0 : index
    %c0_301 = arith.constant 0 : index
    %439 = vector.load %arg17[%c0_300, %c0_301] : memref<64x32xf32, #tpu.memory_space<vmem>>, vector<64x32xf32>
    %cst_302 = arith.constant dense<0.000000e+00> : vector<8x32xf32>
    %440 = tpu.matmul %438, %439, %cst_302 {dimension_numbers = #tpu.dot_dimension_numbers<[1], [0], [0], [1], [0, 0, 1, 1], [], []>} : vector<8x64xf32>, vector<64x32xf32>, vector<8x32xf32> -> vector<8x32xf32>
    %c0_303 = arith.constant 0 : index
    %c0_304 = arith.constant 0 : index
    %441 = vector.load %arg18[%c0_303, %c0_304] : memref<1x32xf32, #tpu.memory_space<vmem>>, vector<1x32xf32>
    %442 = vector.broadcast %441 : vector<1x32xf32> to vector<8x32xf32>
    %443 = arith.addf %440, %442 : vector<8x32xf32>
    %444 = arith.addf %399, %443 : vector<8x32xf32>
    %c0_305 = arith.constant 0 : index
    %c0_306 = arith.constant 0 : index
    %c0_307 = arith.constant 0 : index
    %445 = vector.load %arg19[%c0_305, %c0_306, %c0_307] : memref<1x8x32xf32, #tpu.memory_space<vmem>>, vector<1x8x32xf32>
    %446 = vector.shape_cast %445 : vector<1x8x32xf32> to vector<8x32xf32>
    %447 = vector.shape_cast %444 : vector<8x32xf32> to vector<1x8x32xf32>
    tpu.vector_store %arg19[%c0_305, %c0_306, %c0_307], %447 {strides = array<i32>} : memref<1x8x32xf32, #tpu.memory_space<vmem>>, vector<1x8x32xf32>,
    return
  }
  func.func @transform_0(%arg0: i32) -> (i32, i32, i32) {
    %c0_i32 = arith.constant 0 : i32
    %c0_i32_0 = arith.constant 0 : i32
    %c0_i32_1 = arith.constant 0 : i32
    return %arg0, %c0_i32, %c0_i32_0 : i32, i32, i32
  }
  func.func @transform_1(%arg0: i32) -> (i32, i32, i32) {
    %c0_i32 = arith.constant 0 : i32
    %c0_i32_0 = arith.constant 0 : i32
    %c0_i32_1 = arith.constant 0 : i32
    return %arg0, %c0_i32, %c0_i32_0 : i32, i32, i32
  }
  func.func @transform_2(%arg0: i32) -> (i32, i32, i32) {
    %c0_i32 = arith.constant 0 : i32
    %c0_i32_0 = arith.constant 0 : i32
    %c0_i32_1 = arith.constant 0 : i32
    return %arg0, %c0_i32, %c0_i32_0 : i32, i32, i32
  }
  func.func @transform_3(%arg0: i32) -> (i32, i32, i32) {
    %c0_i32 = arith.constant 0 : i32
    %c0_i32_0 = arith.constant 0 : i32
    %c0_i32_1 = arith.constant 0 : i32
    return %arg0, %c0_i32, %c0_i32_0 : i32, i32, i32
  }
  func.func @transform_4(%arg0: i32) -> (i32, i32, i32) {
    %c0_i32 = arith.constant 0 : i32
    %c0_i32_0 = arith.constant 0 : i32
    %c0_i32_1 = arith.constant 0 : i32
    %c0_i32_2 = arith.constant 0 : i32
    return %c0_i32, %c0_i32_0, %c0_i32_1 : i32, i32, i32
  }
  func.func @transform_5(%arg0: i32) -> (i32, i32, i32) {
    %c0_i32 = arith.constant 0 : i32
    %c0_i32_0 = arith.constant 0 : i32
    %c0_i32_1 = arith.constant 0 : i32
    %c0_i32_2 = arith.constant 0 : i32
    return %c0_i32, %c0_i32_0, %c0_i32_1 : i32, i32, i32
  }
  func.func @transform_6(%arg0: i32) -> (i32, i32, i32) {
    %c0_i32 = arith.constant 0 : i32
    %c0_i32_0 = arith.constant 0 : i32
    %c0_i32_1 = arith.constant 0 : i32
    %c0_i32_2 = arith.constant 0 : i32
    return %c0_i32, %c0_i32_0, %c0_i32_1 : i32, i32, i32
  }
  func.func @transform_7(%arg0: i32) -> (i32, i32, i32) {
    %c0_i32 = arith.constant 0 : i32
    %c0_i32_0 = arith.constant 0 : i32
    %c0_i32_1 = arith.constant 0 : i32
    %c0_i32_2 = arith.constant 0 : i32
    return %c0_i32, %c0_i32_0, %c0_i32_1 : i32, i32, i32
  }
  func.func @transform_8(%arg0: i32) -> (i32, i32, i32) {
    %c0_i32 = arith.constant 0 : i32
    %c0_i32_0 = arith.constant 0 : i32
    %c0_i32_1 = arith.constant 0 : i32
    %c0_i32_2 = arith.constant 0 : i32
    return %c0_i32, %c0_i32_0, %c0_i32_1 : i32, i32, i32
  }
  func.func @transform_9(%arg0: i32) -> (i32, i32, i32) {
    %c0_i32 = arith.constant 0 : i32
    %c0_i32_0 = arith.constant 0 : i32
    %c0_i32_1 = arith.constant 0 : i32
    %c0_i32_2 = arith.constant 0 : i32
    return %c0_i32, %c0_i32_0, %c0_i32_1 : i32, i32, i32
  }
  func.func @transform_10(%arg0: i32) -> (i32, i32, i32) {
    %c0_i32 = arith.constant 0 : i32
    %c0_i32_0 = arith.constant 0 : i32
    %c0_i32_1 = arith.constant 0 : i32
    %c0_i32_2 = arith.constant 0 : i32
    return %c0_i32, %c0_i32_0, %c0_i32_1 : i32, i32, i32
  }
  func.func @transform_11(%arg0: i32) -> (i32, i32, i32) {
    %c0_i32 = arith.constant 0 : i32
    %c0_i32_0 = arith.constant 0 : i32
    %c0_i32_1 = arith.constant 0 : i32
    %c0_i32_2 = arith.constant 0 : i32
    return %c0_i32, %c0_i32_0, %c0_i32_1 : i32, i32, i32
  }
  func.func @transform_12(%arg0: i32) -> (i32, i32, i32) {
    %c0_i32 = arith.constant 0 : i32
    %c0_i32_0 = arith.constant 0 : i32
    %c0_i32_1 = arith.constant 0 : i32
    %c0_i32_2 = arith.constant 0 : i32
    return %c0_i32, %c0_i32_0, %c0_i32_1 : i32, i32, i32
  }
  func.func @transform_13(%arg0: i32) -> (i32, i32, i32) {
    %c0_i32 = arith.constant 0 : i32
    %c0_i32_0 = arith.constant 0 : i32
    %c0_i32_1 = arith.constant 0 : i32
    %c0_i32_2 = arith.constant 0 : i32
    return %c0_i32, %c0_i32_0, %c0_i32_1 : i32, i32, i32
  }
  func.func @transform_14(%arg0: i32) -> (i32, i32) {
    %c0_i32 = arith.constant 0 : i32
    %c0_i32_0 = arith.constant 0 : i32
    %c0_i32_1 = arith.constant 0 : i32
    return %c0_i32, %c0_i32_0 : i32, i32
  }
  func.func @transform_15(%arg0: i32) -> (i32, i32) {
    %c0_i32 = arith.constant 0 : i32
    %c0_i32_0 = arith.constant 0 : i32
    %c0_i32_1 = arith.constant 0 : i32
    return %c0_i32, %c0_i32_0 : i32, i32
  }
  func.func @transform_16(%arg0: i32) -> (i32, i32) {
    %c0_i32 = arith.constant 0 : i32
    %c0_i32_0 = arith.constant 0 : i32
    %c0_i32_1 = arith.constant 0 : i32
    return %c0_i32, %c0_i32_0 : i32, i32
  }
  func.func @transform_17(%arg0: i32) -> (i32, i32) {
    %c0_i32 = arith.constant 0 : i32
    %c0_i32_0 = arith.constant 0 : i32
    %c0_i32_1 = arith.constant 0 : i32
    return %c0_i32, %c0_i32_0 : i32, i32
  }
  func.func @transform_18(%arg0: i32) -> (i32, i32, i32) {
    %c0_i32 = arith.constant 0 : i32
    %c0_i32_0 = arith.constant 0 : i32
    %c0_i32_1 = arith.constant 0 : i32
    return %arg0, %c0_i32, %c0_i32_0 : i32, i32, i32
  }
}

</mosaic_0001>

<bundles_post_ra>
// kernel: decoder_layer.1
= control target key start
LH: loop header
LB: loop body
LE: loop exit
PB: predicated region body
PF: predicated region fallthrough
CT: control target
= control target key end

     0   :  { %s6918_s0 = inlined_call_operand.vmem [shape: f32[2,8,32], index: 0, kind: input, shape index: {}]   ;;  %s6919_s1 = inlined_call_operand.vmem [shape: f32[2,8,32], index: 1, kind: input, shape index: {}]   ;;  %s6920_s2 = inlined_call_operand.vmem [shape: f32[2,8,8], index: 2, kind: input, shape index: {}]   ;;  %s6921_s3 = inlined_call_operand.vmem [shape: f32[2,8,8], index: 3, kind: input, shape index: {}]   ;;  %s6922_s4 = inlined_call_operand.vmem [shape: f32[3,1,32], index: 4, kind: input, shape index: {}]   ;;  %s6923_s5 = inlined_call_operand.vmem [shape: f32[3,1,32], index: 5, kind: input, shape index: {}]   ;;  %s6924_s6 = inlined_call_operand.vmem [shape: f32[8,32,8], index: 6, kind: input, shape index: {}]   ;;  %s6925_s7 = inlined_call_operand.vmem [shape: f32[8,1,8], index: 7, kind: input, shape index: {}]   ;;  %s6926_s8 = inlined_call_operand.vmem [shape: f32[8,32,8], index: 8, kind: input, shape index: {}]   ;;  %s6927_s9 = inlined_call_operand.vmem [shape: f32[8,1,8], index: 9, kind: input, shape index: {}]   ;;  %s6928_s10 = inlined_call_operand.vmem [shape: f32[8,32,8], index: 10, kind: input, shape index: {}]   ;;  %s6929_s11 = inlined_call_operand.vmem [shape: f32[8,1,8], index: 11, kind: input, shape index: {}]   ;;  %s6930_s12 = inlined_call_operand.vmem [shape: f32[8,8,32], index: 12, kind: input, shape index: {}]   ;;  %s6931_s13 = inlined_call_operand.vmem [shape: f32[2,1,32], index: 13, kind: input, shape index: {}]   ;;  %s6932_s14 = inlined_call_operand.vmem [shape: f32[32,64], index: 14, kind: input, shape index: {}]   ;;  %s6933_s15 = inlined_call_operand.vmem [shape: f32[1,64], index: 15, kind: input, shape index: {}]   ;;  %s6934_s16 = inlined_call_operand.vmem [shape: f32[64,32], index: 16, kind: input, shape index: {}]   ;;  %s6935_s17 = inlined_call_operand.vmem [shape: f32[1,32], index: 17, kind: input, shape index: {}]   ;;  %s6936_s18 = inlined_call_operand.hbm [shape: f32[2,8,32], index: 18, kind: output, shape index: {}]  }
   0x1   :  { %6942 = sst [smem:[#allocation10_spill]] %s6918_s0 }
   0x2   :  { %6943 = sst [smem:[#allocation11_spill]] %s6919_s1 }
   0x3   :  { %6944 = sst [smem:[#allocation12_spill]] %s6920_s2 }
   0x4   :  { %6945 = sst [smem:[#allocation13_spill]] %s6921_s3 }
   0x5   :  { %23 = vsyncpa [#allocation3], 0 }
   0x6   :  { %25 = vsyncpa [#allocation3 + $0x1], 0  ;;  %s5975_s27 = smov 0   ;;  %s5977_s28 = smov 0  }
   0x7   :  { %s5979_s29 = smov 0   ;;  %s5981_s30 = smov 0  }
   0x8 LB: > { %6946 = sst [smem:[#allocation5_spill]] %s5863_s27  ;;  %s5996_s0 = sadd.s32 4294967295, %s5875_s30   ;;  %s5875_s30 = sphi %s5981_s30, %s6959_s30   ;;  %s5871_s29 = sphi %s5979_s29, %s6961_s29   ;;  %s5867_s28 = sphi %s5977_s28, %s6963_s28   ;;  %s5863_s27 = sphi %s5975_s27, %s6962_s27  }
   0x9   : > { %6947 = sst [smem:[#allocation6_spill]] %s5871_s29  ;;  %s4916_s19 = sadd.s32 4294967294, %s5875_s30  }
   0xa   : > { %s6000_s1 = sadd.s32 1, %s5875_s30   ;;  %s436_s20 = sadd.s32 1, %s5871_s29 }
   0xb   : > { %6948 = sst [smem:[#allocation7_spill]] %s6000_s1  ;;  %s433_s21 = ssub.s32 %s5875_s30, %s6000_s1 }
   0xc   : > { %p446_p0 = scmp.ne.s32.totalorder %s5871_s29, %s5867_s28  ;;  %p434_p1 = scmp.eq.s32.totalorder %s433_s21, 0 }
   0xd   : > { %p447_p2 = scmp.eq.s32.totalorder %s5996_s0, 1  ;;  %p452_p3 = scmp.ne.s32.totalorder %s5867_s28, %s5863_s27 }
   0xe   : > { %p453_p4 = scmp.eq.s32.totalorder %s4916_s19, 1  ;;  %p4919_p7 = scmp.ge.s32.totalorder %s5875_s30, 1 }
   0xf   : > { %s6011_s22 = scalar_select %p434_p1, %s5871_s29, %s436_s20  }
  0x10   : > { %p6013_p5 = por %p447_p2, %p446_p0  ;;  %p6017_p6 = por %p453_p4, %p452_p3 }
  0x11   : > { %6949 = sst [smem:[#allocation8_spill]] %s6011_s22  ;;  %p541_p8 = scmp.lt.s32.totalorder %s5875_s30, 3 }
  0x12   : > { %s6951_s23 = scalar_select %p6017_p6, 1, 0 }
  0x13   : > { %p542_p9 = pnand %p4919_p7, %p541_p8 }
  0x14   : > { %6952 = sst [smem:[#allocation9_spill]] %s6951_s23  ;;  %p606_p10 = scmp.lt.s32.totalorder (!%p542_p9), %s5996_s0, 1 }
  0x15   : > { %545 = sbr.rel (%p542_p9) target bundleno = 8607 (0x219f), region = 92  ;;  %s6953_s20 = sld [smem:[#allocation10_spill]] (!%p542_p9) }
  0x16   : > { %s6955_s19 = sld [smem:[#allocation11_spill]] (!%p542_p9) }
  0x17   : > { %s6956_s3 = sld [smem:[#allocation13_spill]] (!%p542_p9) }
  0x1a   : > { %s607_s24 = scalar_select %p606_p10, %s5996_s0, 1  ;;  %vm626_vm0 = vcmask 261120   ;;  %v5877_v7 = vmov 0.0   ;;  %v660_v8 = vld [vmem:[%s6924_s6 + $0x18] sm:$0xff]  ;;  %v659_v10 = vld [vmem:[%s6924_s6 + $0x10] sm:$0xff]  ;;  %v658_v12 = vld [vmem:[%s6924_s6 + $0x8] sm:$0xff] }
  0x1b   : > { %5320 = vmatprep.subr.mxu0 %v5877_v7  ;;  %5331 = vmatprep.subr.mxu1 %v5877_v7  ;;  %v744_v9 = vld [vmem:[%s6926_s8 + $0x18] sm:$0xff]  ;;  %v743_v11 = vld [vmem:[%s6926_s8 + $0x10] sm:$0xff]  ;;  %v742_v13 = vld [vmem:[%s6926_s8 + $0x8] sm:$0xff]  ;;  %vm5878_vm1 = vmmov 0   ;;  %vm903_vm2 = vcmask 64512   ;;  %vm4731_vm5 = vcmask 523264  }
  0x1c   : > { %s6025_s25 = sshll.u32 %s607_s24, 3  ;;  %5321 = vmatpush3.msra.mxu0 %v660_v8  ;;  %5332 = vmatpush3.msra.mxu1 %v744_v9  ;;  %v657_v14 = vld [vmem:[%s6924_s6] sm:$0xff]  ;;  %v825_v25 = vld [vmem:[%s6928_s10 + $0x18] sm:$0xff]  ;;  %v824_v26 = vld [vmem:[%s6928_s10 + $0x10] sm:$0xff]  ;;  %s5135_s24 = sshll.u32 %s5996_s0, 7 }
  0x1d   : > { %s609_s21 = scalar_lea.vmem %s6953_s20, %s6025_s25  ;;  %5322 = vmatprep.subr.mxu0 %v5877_v7  ;;  %5333 = vmatprep.subr.mxu1 %v5877_v7  ;;  %v741_v15 = vld [vmem:[%s6926_s8] sm:$0xff]  ;;  %v823_v27 = vld [vmem:[%s6928_s10 + $0x8] sm:$0xff]  ;;  %v4939_v37 = vld [vmem:[%s6924_s6 + $0x38] sm:$0xff]  ;;  %s6954_s20 = sld [smem:[#allocation12_spill]] }
  0x1e   : > { %v6031_v0 = vld [vmem:[%s609_s21] sm:$0xff]  ;;  %5323 = vmatpush3.msra.mxu0 %v659_v10  ;;  %5334 = vmatpush3.msra.mxu1 %v743_v11  ;;  %v4938_v39 = vld [vmem:[%s6924_s6 + $0x30] sm:$0xff]  ;;  %v4937_v41 = vld [vmem:[%s6924_s6 + $0x28] sm:$0xff]  ;;  %s5879_s0 = smov [#allocation2]  }
  0x1f   : > { %v627_v1 = vsel %vm626_vm0, %v6031_v0, 0.0  ;;  %5324 = vmatprep.subr.mxu0 %v5877_v7  ;;  %5335 = vmatprep.subr.mxu1 %v5877_v7  ;;  %v4925_v20 = vld [vmem:[%s6922_s4] ss:$0 sm:$0xff]  ;;  %v4953_v45 = vld [vmem:[%s6928_s10 + $0x38] sm:$0xff]  ;;  %v4952_v46 = vld [vmem:[%s6928_s10 + $0x30] sm:$0xff] }
  0x20   : > { %628 = vadd.xlane.f32.xlu0 %v627_v1  ;;  %5325 = vmatpush3.msra.mxu0 %v658_v12  ;;  %v4926_v22 = vld [vmem:[%s6923_s5] ss:$0 sm:$0xff]  ;;  %v4951_v47 = vld [vmem:[%s6928_s10 + $0x28] sm:$0xff]  ;;  %v4948_v10 = vld [vmem:[%s6927_s9 + $0x1] ss:$0 sm:$0xff] }
  0x21   : > { %5326 = vmatprep.subr.mxu0 %v5877_v7  ;;  %5336 = vmatpush3.msra.mxu1 %v742_v13  ;;  %v822_v28 = vld [vmem:[%s6928_s10] sm:$0xff] }
  0x22   : > { %5327 = vmatpush3.msra.mxu0 %v657_v14  ;;  %5337 = vmatprep.subr.mxu1 %v5877_v7  ;;  %v4929_v29 = vld [vmem:[%s6927_s9] ss:$0 sm:$0xff]  ;;  %v4941_v12 = vld [vmem:[%s6925_s7 + $0x1] ss:$0 sm:$0xff] }
  0x23   : > { %5328 = vmatprep.mubr.msk.f32.mxu0 %vm5878_vm1, %v5877_v7  ;;  %5338 = vmatpush3.msra.mxu1 %v741_v15  ;;  %v4927_v32 = vld [vmem:[%s6925_s7] ss:$0 sm:$0xff]  ;;  %s617_s22 = scalar_lea.vmem %s6954_s20, %s6025_s25  ;;  %v4955_v14 = vld [vmem:[%s6929_s11 + $0x1] ss:$0 sm:$0xff]  ;;  %s613_s20 = scalar_lea.vmem %s6955_s19, %s6025_s25 }
  0x24   : > { %5339 = vmatprep.mubr.msk.f32.mxu1 %vm5878_vm1, %v5877_v7  ;;  %5342 = vmatprep.subr.mxu0 %v5877_v7  ;;  %v4931_v38 = vld [vmem:[%s6929_s11] ss:$0 sm:$0xff] }
  0x25   : > { %5358 = vmatprep.subr.mxu1 %v5877_v7  ;;  %v4936_v44 = vld [vmem:[%s6924_s6 + $0x20] sm:$0xff] }
  0x26   : > { %v4950_v48 = vld [vmem:[%s6928_s10 + $0x20] sm:$0xff] }
  0x27   : > { %v6170_v49 = vld [vmem:[%s617_s22] sm:$0xff]  ;;  %s603_s22 = sand.u32 1, %s5867_s28  }
  0x28   : > { %vm980_vm3 = vcmp.eq.f32.partialorder %v6170_v49, 0.0  ;;  %s4920_s21 = sshll.u32 %s603_s22, 3 }
  0x29   : > { %s605_s26 = scalar_lea.vmem [#allocation2], %s4920_s21  ;;  %s5819_s21 = sshll.u32 %s5879_s0, 4  ;;  %s5820_s21 = int_to_ptr.vmem [resolvable:$false] %s5819_s21 }
  0x2a   : > { %s4821_s19 = sshll.u32 %s605_s26, 4  ;;  %s5821_s29 = scalar_lea.vmem %s5820_s21, 256  ;;  %s4822_s19 = int_to_ptr.vmem [resolvable:$true] %s4821_s19 }
  0x2b   : > { %p5822_p0 = scmp.lt.s32.totalorder %s4822_s19, %s5820_s21 }
  0xa9   : > { %v629_v2 = vpop.xlane.xlu0 %628 }
  0xaa   : > { %v631_v3 = vmul.f32 0.03125, %v629_v2 }
  0xac   : > { %v632_v4 = vsub.f32 %v6031_v0, %v631_v3  ;;  %v4946_v3 = vld [vmem:[%s6926_s8 + $0x38] sm:$0xff] }
  0xae   : > { %v633_v5 = vmul.f32 %v632_v4, %v632_v4 }
  0xb0   : > { %v634_v6 = vsel %vm626_vm0, %v633_v5, 0.0  ;;  %v4944_v5 = vld [vmem:[%s6926_s8 + $0x28] sm:$0xff] }
  0xb1   : > { %635 = vadd.xlane.f32.xlu0 %v634_v6  ;;  %v4943_v6 = vld [vmem:[%s6926_s8 + $0x20] sm:$0xff] }
 0x13a   : > { %v636_v16 = vpop.xlane.xlu0 %635 }
 0x13b   : > { %v637_v17 = vmul.f32 0.03125, %v636_v16 }
 0x13d   : > { %v638_v18 = vadd.f32 1e-05, %v637_v17 }
 0x13f   : > { %5775 = vrsqrt.f32 %v638_v18 }
 0x14c   : > { %v5776_v19 = vpop.eup %5775 }
 0x14d   : > { %v640_v21 = vmul.f32 %v5776_v19, %v632_v4  ;;  %v4945_v4 = vld [vmem:[%s6926_s8 + $0x30] sm:$0xff] }
 0x14f   : > { %v648_v23 = vmul.f32 %v4925_v20, %v640_v21 }
 0x151   : > { %v6081_v24 = vadd.f32 %v4926_v22, %v648_v23 }
 0x153   : > { %5329 = vmatmul.mubr.msk.f32.vlgmr.msra.gmra.mxu0 %vm626_vm0, %v6081_v24  ;;  %5340 = vmatmul.mubr.msk.f32.vlgmr.msra.gmra.mxu1 %vm626_vm0, %v6081_v24 }
 0x154   : > { %5343 = vmatpush3.msra.mxu0 %v825_v25  ;;  %5350 = vmatprep.mubr.msk.f32.mxu0 %vm5878_vm1, %v5877_v7 }
 0x155   : > { %5344 = vmatprep.subr.mxu0 %v5877_v7  ;;  %5360 = vmatprep.mubr.msk.f32.mxu1 %vm5878_vm1, %v5877_v7 }
 0x156   : > { %5345 = vmatpush3.msra.mxu0 %v824_v26 }
 0x157   : > { %5346 = vmatprep.subr.mxu0 %v5877_v7 }
 0x158   : > { %5347 = vmatpush3.msra.mxu0 %v823_v27 }
 0x159   : > { %5348 = vmatprep.subr.mxu0 %v5877_v7 }
 0x15a   : > { %5349 = vmatpush3.msra.mxu0 %v822_v28  ;;  %v4960_v28 = vld [vmem:[%s6930_s12 + $0x8] sm:$0xff] }
 0x15b   : > { %5351 = vmatmul.mubr.msk.f32.vlgmr.msra.gmra.mxu0 %vm626_vm0, %v6081_v24  ;;  %5353 = vmatprep.subr.mxu0 %v5877_v7 }
 0x15c   : > { %5355 = vmatprep.mubr.msk.f32.mxu0 %vm5878_vm1, %v5877_v7 }
 0x213   : > { %v737_v30 = vpop.f32.mrf.mxu0  ;;  %v818_v31 = vpop.f32.mrf.mxu1 }
 0x214   : > { %v819_v33 = vadd.f32 %v4929_v29, %v818_v31  ;;  %v738_v36 = vadd.f32 %v4927_v32, %v737_v30  ;;  %v1066_v32 = vld [vmem:[%s6930_s12] sm:$0xff] }
 0x215   : > { %v5330_v34 = vpop.f32.mrf.mxu0  ;;  %v5341_v35 = vpop.f32.mrf.mxu1 }
 0x216   : > { %5354 = vmatpush3.xpose.msk.msra.mxu0 %vm903_vm2, %v819_v33  ;;  %v4973_v33 = vld [vmem:[%s6926_s8 + $0x58] sm:$0xff]  ;;  %v4972_v34 = vld [vmem:[%s6926_s8 + $0x50] sm:$0xff]  ;;  %v4971_v35 = vld [vmem:[%s6926_s8 + $0x48] sm:$0xff] }
 0x217   : > { %5363 = vmatprep.subr.mxu0 %v5877_v7 }
 0x219   : > { %5356 = vmatmul.mubr.msk.f32.vlgmr.msra.gmra.mxu0 %vm903_vm2, %v738_v36  ;;  %v4970_v36 = vld [vmem:[%s6926_s8 + $0x40] sm:$0xff] }
 0x21a   : > { %5364 = vmatpush3.msra.mxu0 %v4939_v37  ;;  %5371 = vmatprep.mubr.msk.f32.mxu0 %vm5878_vm1, %v5877_v7  ;;  %v4966_v37 = vld [vmem:[%s6924_s6 + $0x58] sm:$0xff] }
 0x21b   : > { %v899_v40 = vpop.f32.mrf.mxu0  ;;  %5365 = vmatprep.subr.mxu0 %v5877_v7 }
 0x21c   : > { %v900_v42 = vadd.f32 %v4931_v38, %v899_v40  ;;  %5366 = vmatpush3.msra.mxu0 %v4938_v39  ;;  %v4965_v39 = vld [vmem:[%s6924_s6 + $0x50] sm:$0xff] }
 0x21d   : > { %v5352_v43 = vpop.f32.mrf.mxu0  ;;  %5367 = vmatprep.subr.mxu0 %v5877_v7 }
 0x21e   : > { %5359 = vmatpush3.msra.mxu1 %v900_v42  ;;  %5368 = vmatpush3.msra.mxu0 %v4937_v41  ;;  %v4964_v41 = vld [vmem:[%s6924_s6 + $0x48] sm:$0xff]  ;;  %v4963_v43 = vld [vmem:[%s6924_s6 + $0x40] sm:$0xff] }
 0x21f   : > { %5369 = vmatprep.subr.mxu0 %v5877_v7  ;;  %5374 = vmatprep.subr.mxu1 %v5877_v7 }
 0x220   : > { %5370 = vmatpush3.msra.mxu0 %v4936_v44 }
 0x221   : > { %5372 = vmatmul.mubr.msk.f32.vlgmr.msra.gmra.mxu0 %vm626_vm0, %v6081_v24  ;;  %5385 = vmatprep.subr.mxu0 %v5877_v7 }
 0x222   : > { %5386 = vmatpush3.msra.mxu0 %v4953_v45  ;;  %5393 = vmatprep.mubr.msk.f32.mxu0 %vm5878_vm1, %v5877_v7  ;;  %v4980_v45 = vld [vmem:[%s6928_s10 + $0x58] sm:$0xff] }
 0x223   : > { %5387 = vmatprep.subr.mxu0 %v5877_v7 }
 0x224   : > { %5388 = vmatpush3.msra.mxu0 %v4952_v46  ;;  %v4979_v46 = vld [vmem:[%s6928_s10 + $0x50] sm:$0xff] }
 0x225   : > { %5389 = vmatprep.subr.mxu0 %v5877_v7 }
 0x226   : > { %5390 = vmatpush3.msra.mxu0 %v4951_v47  ;;  %v4975_v47 = vld [vmem:[%s6927_s9 + $0x2] ss:$0 sm:$0xff] }
 0x227   : > { %5391 = vmatprep.subr.mxu0 %v5877_v7 }
 0x228   : > { %5392 = vmatpush3.msra.mxu0 %v4950_v48  ;;  %v4978_v48 = vld [vmem:[%s6928_s10 + $0x48] sm:$0xff] }
 0x229   : > { %5394 = vmatmul.mubr.msk.f32.vlgmr.msra.gmra.mxu0 %vm626_vm0, %v6081_v24  ;;  %5406 = vmatprep.subr.mxu0 %v5877_v7 }
 0x22a   : > { %5408 = vmatprep.mubr.msk.f32.mxu0 %vm5878_vm1, %v5877_v7  ;;  %5407 = vmatpush3.msra.mxu0 %v4960_v28  ;;  %v4997_v28 = vld [vmem:[%s6926_s8 + $0x68] sm:$0xff] }
 0x22b   : > { %5416 = vmatprep.subr.mxu0 %v5877_v7 }
 0x2d9   : > { %v976_v50 = vpop.f32.mrf.mxu0 }
 0x2da   : > { %v981_v51 = vsel %vm980_vm3, -10000.0, %v976_v50 }
 0x2db   : > { %v5357_v52 = vpop.f32.mrf.mxu0  ;;  %v982_v53 = vsel %vm903_vm2, %v981_v51, -inf }
 0x2dc   : > { %983 = vmax.xlane.f32.xlu1 %v982_v53  ;;  %v4977_v52 = vld [vmem:[%s6928_s10 + $0x40] sm:$0xff] }
 0x2e1   : > { %v1146_v54 = vpop.f32.mrf.mxu0 }
 0x2e2   : > { %v1147_v16 = vadd.f32 %v4941_v12, %v1146_v54 }
 0x2e3   : > { %v5373_v55 = vpop.f32.mrf.mxu0 }
 0x2e9   : > { %v1312_v56 = vpop.f32.mrf.mxu0 }
 0x2ea   : > { %v1313_v17 = vadd.f32 %v4955_v14, %v1312_v56  ;;  %v4968_v56 = vld [vmem:[%s6925_s7 + $0x2] ss:$0 sm:$0xff] }
 0x2eb   : > { %v5395_v57 = vpop.f32.mrf.mxu0 }
 0x365   : > { %v984_v58 = vpop.xlane.xlu1 %983 }
 0x366   : > { %v985_v59 = vsub.f32 %v981_v51, %v984_v58 }
 0x368   : > { %v986_v60 = vmul.f32 1.442695, %v985_v59 }
 0x36a   : > { %5777 = vpow2.f32 %v986_v60  ;;  %v4982_v60 = vld [vmem:[%s6929_s11 + $0x2] ss:$0 sm:$0xff] }
 0x377   : > { %v5778_v61 = vpop.eup %5777 }
 0x378   : > { %v988_v62 = vsel %vm903_vm2, %v5778_v61, 0.0 }
 0x379   : > { %989 = vadd.xlane.f32.xlu1 %v988_v62 }
 0x402   : > { %v990_v63 = vpop.xlane.xlu1 %989 }
 0x403   : > { %5779 = vrcp.f32 %v990_v63 }
 0x410   : > { %v5780_v1 = vpop.eup %5779 }
 0x411   : > { %v992_v2 = vmul.f32 %v5780_v1, %v5778_v61 }
 0x413   : > { %5361 = vmatmul.mubr.msk.f32.vlgmr.msra.gmra.mxu1 %vm903_vm2, %v992_v2 }
 0x414   : > { %5375 = vmatpush3.msra.mxu1 %v4946_v3  ;;  %5382 = vmatprep.mubr.msk.f32.mxu1 %vm5878_vm1, %v5877_v7 }
 0x415   : > { %5376 = vmatprep.subr.mxu1 %v5877_v7 }
 0x416   : > { %5377 = vmatpush3.msra.mxu1 %v4945_v4 }
 0x417   : > { %5378 = vmatprep.subr.mxu1 %v5877_v7 }
 0x418   : > { %5379 = vmatpush3.msra.mxu1 %v4944_v5 }
 0x419   : > { %5380 = vmatprep.subr.mxu1 %v5877_v7 }
 0x41a   : > { %5381 = vmatpush3.msra.mxu1 %v4943_v6 }
 0x41b   : > { %5383 = vmatmul.mubr.msk.f32.vlgmr.msra.gmra.mxu1 %vm626_vm0, %v6081_v24  ;;  %5396 = vmatprep.subr.mxu1 %v5877_v7 }
 0x41c   : > { %5398 = vmatprep.mubr.msk.f32.mxu1 %vm5878_vm1, %v5877_v7 }
 0x4d3   : > { %v1062_v8 = vpop.f32.mrf.mxu1 }
 0x4d5   : > { %v5362_v9 = vpop.f32.mrf.mxu1 }
 0x4db   : > { %v1229_v11 = vpop.f32.mrf.mxu1 }
 0x4dc   : > { %v1230_v13 = vadd.f32 %v4948_v10, %v1229_v11  ;;  %v4987_v11 = vld [vmem:[%s6930_s12 + $0x10] sm:$0xff] }
 0x4dd   : > { %v5384_v15 = vpop.f32.mrf.mxu1 }
 0x4de   : > { %5397 = vmatpush3.xpose.msk.msra.mxu1 %vm903_vm2, %v1230_v13  ;;  %v4992_v15 = vld [vmem:[%s6924_s6 + $0x78] sm:$0xff] }
 0x4df   : > { %5401 = vmatprep.subr.mxu1 %v5877_v7 }
 0x4e1   : > { %5399 = vmatmul.mubr.msk.f32.vlgmr.msra.gmra.mxu1 %vm903_vm2, %v1147_v16  ;;  %v4991_v16 = vld [vmem:[%s6924_s6 + $0x70] sm:$0xff] }
 0x4e2   : > { %5402 = vmatpush3.msra.mxu1 %v1313_v17  ;;  %5403 = vmatprep.mubr.msk.f32.mxu1 %vm5878_vm1, %v5877_v7  ;;  %v4990_v17 = vld [vmem:[%s6924_s6 + $0x68] sm:$0xff] }
 0x4e3   : > { %5411 = vmatprep.subr.mxu1 %v5877_v7 }
 0x5a1   : > { %v1388_v18 = vpop.f32.mrf.mxu1 }
 0x5a2   : > { %v1392_v19 = vsel %vm980_vm3, -10000.0, %v1388_v18  ;;  %v4989_v18 = vld [vmem:[%s6924_s6 + $0x60] sm:$0xff] }
 0x5a3   : > { %v5400_v20 = vpop.f32.mrf.mxu1  ;;  %v1393_v21 = vsel %vm903_vm2, %v1392_v19, -inf }
 0x5a4   : > { %1394 = vmax.xlane.f32.xlu0 %v1393_v21  ;;  %v5005_v20 = vld [vmem:[%s6928_s10 + $0x70] sm:$0xff]  ;;  %v5004_v21 = vld [vmem:[%s6928_s10 + $0x68] sm:$0xff] }
 0x62d   : > { %v1395_v22 = vpop.xlane.xlu0 %1394 }
 0x62e   : > { %v1396_v23 = vsub.f32 %v1392_v19, %v1395_v22  ;;  %v5006_v19 = vld [vmem:[%s6928_s10 + $0x78] sm:$0xff]  ;;  %v5003_v22 = vld [vmem:[%s6928_s10 + $0x60] sm:$0xff] }
 0x630   : > { %v1397_v25 = vmul.f32 1.442695, %v1396_v23  ;;  %v4999_v23 = vld [vmem:[%s6926_s8 + $0x78] sm:$0xff] }
 0x632   : > { %5781 = vpow2.f32 %v1397_v25 }
 0x63f   : > { %v5782_v26 = vpop.eup %5781 }
 0x640   : > { %v1399_v27 = vsel %vm903_vm2, %v5782_v26, 0.0 }
 0x641   : > { %1400 = vadd.xlane.f32.xlu1 %v1399_v27 }
 0x6ca   : > { %v1401_v29 = vpop.xlane.xlu1 %1400 }
 0x6cb   : > { %5783 = vrcp.f32 %v1401_v29  ;;  %v4996_v29 = vld [vmem:[%s6926_s8 + $0x60] sm:$0xff] }
 0x6d8   : > { %v5784_v30 = vpop.eup %5783 }
 0x6d9   : > { %v1403_v31 = vmul.f32 %v5784_v30, %v5782_v26  ;;  %v4998_v26 = vld [vmem:[%s6926_s8 + $0x70] sm:$0xff] }
 0x6db   : > { %5404 = vmatmul.mubr.msk.f32.vlgmr.msra.gmra.mxu1 %vm903_vm2, %v1403_v31 }
 0x6dc   : > { %5412 = vmatpush3.msra.mxu1 %v1066_v32  ;;  %5413 = vmatprep.mubr.msk.f32.mxu1 %vm5878_vm1, %v5877_v7 }
 0x6dd   : > { %5427 = vmatprep.subr.mxu1 %v5877_v7 }
 0x6df   : > { %5414 = vmatmul.mubr.msk.f32.vlgmr.msra.gmra.mxu1 %vm903_vm2, %v1062_v8 }
 0x6e0   : > { %5428 = vmatpush3.msra.mxu1 %v4973_v33  ;;  %5435 = vmatprep.mubr.msk.f32.mxu1 %vm5878_vm1, %v5877_v7 }
 0x6e1   : > { %5429 = vmatprep.subr.mxu1 %v5877_v7 }
 0x6e2   : > { %5430 = vmatpush3.msra.mxu1 %v4972_v34 }
 0x6e3   : > { %5431 = vmatprep.subr.mxu1 %v5877_v7 }
 0x6e4   : > { %5432 = vmatpush3.msra.mxu1 %v4971_v35 }
 0x6e5   : > { %5433 = vmatprep.subr.mxu1 %v5877_v7 }
 0x6e6   : > { %5434 = vmatpush3.msra.mxu1 %v4970_v36 }
 0x6e7   : > { %5436 = vmatmul.mubr.msk.f32.vlgmr.msra.gmra.mxu1 %vm626_vm0, %v6081_v24  ;;  %5449 = vmatprep.subr.mxu1 %v5877_v7 }
 0x6e8   : > { %5451 = vmatprep.mubr.msk.f32.mxu1 %vm5878_vm1, %v5877_v7 }
 0x79b   : > { %v1473_v38 = vpop.f32.mrf.mxu1 }
 0x79c   : > { %5409 = vmatmul.mubr.msk.f32.vlgmr.msra.gmra.mxu0 %vm903_vm2, %v1473_v38  ;;  %v5001_v38 = vld [vmem:[%s6927_s9 + $0x3] ss:$0 sm:$0xff] }
 0x79d   : > { %5417 = vmatpush3.msra.mxu0 %v4966_v37  ;;  %v5405_v40 = vpop.f32.mrf.mxu1  ;;  %5424 = vmatprep.mubr.msk.f32.mxu0 %vm5878_vm1, %v5877_v7 }
 0x79e   : > { %5418 = vmatprep.subr.mxu0 %v5877_v7 }
 0x79f   : > { %5419 = vmatpush3.msra.mxu0 %v4965_v39  ;;  %v6266_v42 = vpop.f32.mrf.mxu1 }
 0x7a0   : > { %5420 = vmatprep.subr.mxu0 %v5877_v7 }
 0x7a1   : > { %5421 = vmatpush3.msra.mxu0 %v4964_v41  ;;  %v5415_v44 = vpop.f32.mrf.mxu1  ;;  %v5008_v41 = vld [vmem:[%s6929_s11 + $0x3] ss:$0 sm:$0xff] }
 0x7a2   : > { %5422 = vmatprep.subr.mxu0 %v5877_v7 }
 0x7a3   : > { %5423 = vmatpush3.msra.mxu0 %v4963_v43 }
 0x7a4   : > { %5425 = vmatmul.mubr.msk.f32.vlgmr.msra.gmra.mxu0 %vm626_vm0, %v6081_v24  ;;  %5438 = vmatprep.subr.mxu0 %v5877_v7 }
 0x7a5   : > { %5439 = vmatpush3.msra.mxu0 %v4980_v45  ;;  %5446 = vmatprep.mubr.msk.f32.mxu0 %vm5878_vm1, %v5877_v7 }
 0x7a6   : > { %5440 = vmatprep.subr.mxu0 %v5877_v7 }
 0x7a7   : > { %v1787_v50 = vpop.f32.mrf.mxu1  ;;  %5441 = vmatpush3.msra.mxu0 %v4979_v46 }
 0x7a8   : > { %v1788_v51 = vadd.f32 %v4975_v47, %v1787_v50  ;;  %5442 = vmatprep.subr.mxu0 %v5877_v7 }
 0x7a9   : > { %v5437_v53 = vpop.f32.mrf.mxu1  ;;  %5443 = vmatpush3.msra.mxu0 %v4978_v48 }
 0x7aa   : > { %5444 = vmatprep.subr.mxu0 %v5877_v7  ;;  %5450 = vmatpush3.xpose.msk.msra.mxu1 %vm903_vm2, %v1788_v51 }
 0x7ab   : > { %5445 = vmatpush3.msra.mxu0 %v4977_v52  ;;  %5454 = vmatprep.subr.mxu1 %v5877_v7 }
 0x7ac   : > { %5447 = vmatmul.mubr.msk.f32.vlgmr.msra.gmra.mxu0 %vm626_vm0, %v6081_v24  ;;  %5459 = vmatprep.subr.mxu0 %v5877_v7 }
 0x7ad   : > { %5461 = vmatprep.mubr.msk.f32.mxu0 %vm5878_vm1, %v5877_v7  ;;  %5460 = vmatpush3.msra.mxu0 %v4987_v11  ;;  %v5023_v11 = vld [vmem:[%s6924_s6 + $0x98] sm:$0xff] }
 0x7ae   : > { %5475 = vmatprep.subr.mxu0 %v5877_v7 }
 0x85c   : > { %v6303_v54 = vpop.f32.mrf.mxu0 }
 0x85d   : > { %v1622_v34 = vadd.f32 %v6266_v42, %v6303_v54 }
 0x85e   : > { %v5410_v55 = vpop.f32.mrf.mxu0 }
 0x85f   : > { %v5013_v55 = vld [vmem:[%s6930_s12 + $0x18] sm:$0xff] }
 0x864   : > { %v1704_v57 = vpop.f32.mrf.mxu0 }
 0x865   : > { %v1705_v58 = vadd.f32 %v4968_v56, %v1704_v57 }
 0x866   : > { %v5426_v59 = vpop.f32.mrf.mxu0 }
 0x867   : > { %5452 = vmatmul.mubr.msk.f32.vlgmr.msra.gmra.mxu1 %vm903_vm2, %v1705_v58 }
 0x868   : > { %5456 = vmatprep.mubr.msk.f32.mxu1 %vm5878_vm1, %v5877_v7 }
 0x86c   : > { %v1870_v61 = vpop.f32.mrf.mxu0 }
 0x86d   : > { %v1871_v62 = vadd.f32 %v4982_v60, %v1870_v61  ;;  %v5015_v61 = vld [vmem:[%s6931_s13] ss:$0 sm:$0xff] }
 0x86e   : > { %v5448_v63 = vpop.f32.mrf.mxu0 }
 0x86f   : > { %5455 = vmatpush3.msra.mxu1 %v1871_v62 }
 0x870   : > { %5464 = vmatprep.subr.mxu1 %v5877_v7 }
 0x927   : > { %v1946_v1 = vpop.f32.mrf.mxu1 }
 0x928   : > { %v1950_v2 = vsel %vm980_vm3, -10000.0, %v1946_v1 }
 0x929   : > { %v5453_v3 = vpop.f32.mrf.mxu1  ;;  %v1951_v4 = vsel %vm903_vm2, %v1950_v2, -inf }
 0x92a   : > { %1952 = vmax.xlane.f32.xlu0 %v1951_v4 }
 0x9b3   : > { %v1953_v5 = vpop.xlane.xlu0 %1952 }
 0x9b4   : > { %v1954_v6 = vsub.f32 %v1950_v2, %v1953_v5 }
 0x9b6   : > { %v1955_v8 = vmul.f32 1.442695, %v1954_v6 }
 0x9b8   : > { %5785 = vpow2.f32 %v1955_v8 }
 0x9c5   : > { %v5786_v9 = vpop.eup %5785 }
 0x9c6   : > { %v1957_v10 = vsel %vm903_vm2, %v5786_v9, 0.0 }
 0x9c7   : > { %1958 = vadd.xlane.f32.xlu1 %v1957_v10  ;;  %v5030_v10 = vld [vmem:[%s6926_s8 + $0x98] sm:$0xff] }
 0xa50   : > { %v1959_v12 = vpop.xlane.xlu1 %1958 }
 0xa51   : > { %5787 = vrcp.f32 %v1959_v12  ;;  %v5028_v12 = vld [vmem:[%s6926_s8 + $0x88] sm:$0xff] }
 0xa5e   : > { %v5788_v13 = vpop.eup %5787 }
 0xa5f   : > { %v1961_v14 = vmul.f32 %v5788_v13, %v5786_v9  ;;  %v6448_v13 = vld [vmem:[%s613_s20] sm:$0xff]  ;;  %s621_s20 = scalar_lea.vmem %s6956_s3, %s6025_s25  ;;  %s4808_s25 = scalar_lea.sflag [#allocation3], %s603_s22 }
 0xa60   : > { %s5815_s3 = scalar_lea.vmem %s4822_s19, 128 }
 0xa61   : > { %5457 = vmatmul.mubr.msk.f32.vlgmr.msra.gmra.mxu1 %vm903_vm2, %v1961_v14  ;;  %v5022_v14 = vld [vmem:[%s6924_s6 + $0x90] sm:$0xff]  ;;  %p5816_p11 = scmp.ne.s32.totalorder %s4822_s19, %s5815_s3  ;;  %p5823_p1 = scmp.lt.s32.totalorder %s5821_s29, %s5815_s3 }
 0xa62   : > { %5465 = vmatpush3.msra.mxu1 %v4992_v15  ;;  %5472 = vmatprep.mubr.msk.f32.mxu1 %vm5878_vm1, %v5877_v7  ;;  %v5027_v15 = vld [vmem:[%s6926_s8 + $0x80] sm:$0xff] }
 0xa63   : > { %5466 = vmatprep.subr.mxu1 %v5877_v7  ;;  %p5817_p12 = pnand %p5816_p11, %p6013_p5  ;;  %p5824_p2 = por %p5823_p1, %p5822_p0 }
 0xa64   : > { %5467 = vmatpush3.msra.mxu1 %v4991_v16  ;;  %v5021_v16 = vld [vmem:[%s6924_s6 + $0x88] sm:$0xff] }
 0xa65   : > { %5468 = vmatprep.subr.mxu1 %v5877_v7  ;;  %p5818_p13 = pneg %p5817_p12 }
 0xa66   : > { %5469 = vmatpush3.msra.mxu1 %v4990_v17  ;;  %v5020_v17 = vld [vmem:[%s6924_s6 + $0x80] sm:$0xff] }
 0xa67   : > { %5470 = vmatprep.subr.mxu1 %v5877_v7  ;;  %p5825_p3 = pnand %p5824_p2, %p5818_p13 }
 0xa68   : > { %5471 = vmatpush3.msra.mxu1 %v4989_v18 }
 0xa69   : > { %5473 = vmatmul.mubr.msk.f32.vlgmr.msra.gmra.mxu1 %vm626_vm0, %v6081_v24  ;;  %5486 = vmatprep.subr.mxu1 %v5877_v7 }
 0xa6a   : > { %5487 = vmatpush3.msra.mxu1 %v5006_v19  ;;  %5494 = vmatprep.mubr.msk.f32.mxu1 %vm5878_vm1, %v5877_v7 }
 0xa6b   : > { %5488 = vmatprep.subr.mxu1 %v5877_v7 }
 0xa6c   : > { %5489 = vmatpush3.msra.mxu1 %v5005_v20 }
 0xa6d   : > { %5490 = vmatprep.subr.mxu1 %v5877_v7 }
 0xa6e   : > { %5491 = vmatpush3.msra.mxu1 %v5004_v21 }
 0xa6f   : > { %5492 = vmatprep.subr.mxu1 %v5877_v7 }
 0xa70   : > { %5493 = vmatpush3.msra.mxu1 %v5003_v22  ;;  %v5017_v22 = vld [vmem:[%s6922_s4 + $0x1] ss:$0 sm:$0xff] }
 0xa71   : > { %5495 = vmatmul.mubr.msk.f32.vlgmr.msra.gmra.mxu1 %vm626_vm0, %v6081_v24  ;;  %5507 = vmatprep.subr.mxu1 %v5877_v7 }
 0xa72   : > { %5509 = vmatprep.mubr.msk.f32.mxu1 %vm5878_vm1, %v5877_v7  ;;  %5508 = vmatpush3.msra.mxu1 %v5013_v55 }
 0xa73   : > { %5523 = vmatprep.subr.mxu1 %v5877_v7 }
 0xb21   : > { %v2031_v25 = vpop.f32.mrf.mxu1 }
 0xb22   : > { %5462 = vmatmul.mubr.msk.f32.vlgmr.msra.gmra.mxu0 %vm903_vm2, %v2031_v25  ;;  %v5019_v25 = vld [vmem:[%s6923_s5 + $0x1] ss:$0 sm:$0xff] }
 0xb23   : > { %5476 = vmatpush3.msra.mxu0 %v4999_v23  ;;  %v5458_v27 = vpop.f32.mrf.mxu1  ;;  %5483 = vmatprep.mubr.msk.f32.mxu0 %vm5878_vm1, %v5877_v7 }
 0xb24   : > { %5477 = vmatprep.subr.mxu0 %v5877_v7 }
 0xb25   : > { %5478 = vmatpush3.msra.mxu0 %v4998_v26 }
 0xb26   : > { %5479 = vmatprep.subr.mxu0 %v5877_v7 }
 0xb27   : > { %5480 = vmatpush3.msra.mxu0 %v4997_v28  ;;  %v5037_v28 = vld [vmem:[%s6928_s10 + $0x98] sm:$0xff] }
 0xb28   : > { %5481 = vmatprep.subr.mxu0 %v5877_v7 }
 0xb29   : > { %v2190_v30 = vpop.f32.mrf.mxu1  ;;  %5482 = vmatpush3.msra.mxu0 %v4996_v29  ;;  %v5036_v29 = vld [vmem:[%s6928_s10 + $0x90] sm:$0xff] }
 0xb2a   : > { %5484 = vmatmul.mubr.msk.f32.vlgmr.msra.gmra.mxu0 %vm626_vm0, %v6081_v24  ;;  %5497 = vmatprep.subr.mxu0 %v5877_v7  ;;  %v4994_v24 = vld [vmem:[%s6925_s7 + $0x3] ss:$0 sm:$0xff] }
 0xb2b   : > { %v5474_v31 = vpop.f32.mrf.mxu1  ;;  %5499 = vmatprep.mubr.msk.f32.mxu0 %vm5878_vm1, %v5877_v7  ;;  %v2191_v42 = vadd.f32 %v4994_v24, %v2190_v30  ;;  %v5035_v30 = vld [vmem:[%s6928_s10 + $0x88] sm:$0xff]  ;;  %v5025_v24 = vld [vmem:[%s6925_s7 + $0x4] ss:$0 sm:$0xff] }
 0xb2c   : > { %v5034_v31 = vld [vmem:[%s6928_s10 + $0x80] sm:$0xff] }
 0xb31   : > { %v2356_v32 = vpop.f32.mrf.mxu1 }
 0xb32   : > { %v2357_v44 = vadd.f32 %v5008_v41, %v2356_v32  ;;  %v5048_v32 = vld [vmem:[%s6924_s6 + $0xb8] sm:$0xff] }
 0xb33   : > { %v5496_v33 = vpop.f32.mrf.mxu1 }
 0xb34   : > { %v5047_v33 = vld [vmem:[%s6924_s6 + $0xb0] sm:$0xff] }
 0xbe2   : > { %v2106_v35 = vpop.f32.mrf.mxu0 }
 0xbe3   : > { %v2110_v36 = vadd.f32 %v2106_v35, %v1622_v34  ;;  %v5046_v34 = vld [vmem:[%s6924_s6 + $0xa8] sm:$0xff]  ;;  %v5045_v35 = vld [vmem:[%s6924_s6 + $0xa0] sm:$0xff] }
 0xbe4   : > { %v5463_v37 = vpop.f32.mrf.mxu0 }
 0xbea   : > { %v2273_v39 = vpop.f32.mrf.mxu0 }
 0xbeb   : > { %v2274_v40 = vadd.f32 %v5001_v38, %v2273_v39 }
 0xbec   : > { %v5485_v43 = vpop.f32.mrf.mxu0 }
 0xbed   : > { %5498 = vmatpush3.xpose.msk.msra.mxu0 %vm903_vm2, %v2274_v40 }
 0xbee   : > { %5502 = vmatprep.subr.mxu0 %v5877_v7 }
 0xbf0   : > { %5500 = vmatmul.mubr.msk.f32.vlgmr.msra.gmra.mxu0 %vm903_vm2, %v2191_v42  ;;  %v5039_v42 = vld [vmem:[%s6929_s11 + $0x4] ss:$0 sm:$0xff] }
 0xbf1   : > { %5503 = vmatpush3.msra.mxu0 %v2357_v44  ;;  %5504 = vmatprep.mubr.msk.f32.mxu0 %vm5878_vm1, %v5877_v7 }
 0xbf2   : > { %5512 = vmatprep.subr.mxu0 %v5877_v7 }
 0xcb0   : > { %v2432_v45 = vpop.f32.mrf.mxu0 }
 0xcb1   : > { %v2436_v46 = vsel %vm980_vm3, -10000.0, %v2432_v45 }
 0xcb2   : > { %v5501_v47 = vpop.f32.mrf.mxu0  ;;  %v2437_v48 = vsel %vm903_vm2, %v2436_v46, -inf }
 0xcb3   : > { %2438 = vmax.xlane.f32.xlu0 %v2437_v48 }
 0xd3c   : > { %v2439_v50 = vpop.xlane.xlu0 %2438 }
 0xd3d   : > { %v2440_v51 = vsub.f32 %v2436_v46, %v2439_v50  ;;  %v6543_v50 = vld [vmem:[%s621_s20] sm:$0xff]  ;;  %s4819_s20 = scalar_lea.hbm %s6936_s18, %s5135_s24 }
 0xd3e   : > { %vm2968_vm4 = vcmp.eq.f32.partialorder %v6543_v50, 0.0 }
 0xd3f   : > { %v2441_v52 = vmul.f32 1.442695, %v2440_v51 }
 0xd41   : > { %5789 = vpow2.f32 %v2441_v52 }
 0xd4e   : > { %v5790_v53 = vpop.eup %5789 }
 0xd4f   : > { %v2443_v54 = vsel %vm903_vm2, %v5790_v53, 0.0 }
 0xd50   : > { %2444 = vadd.xlane.f32.xlu1 %v2443_v54 }
 0xdd9   : > { %v2445_v49 = vpop.xlane.xlu1 %2444 }
 0xdda   : > { %5791 = vrcp.f32 %v2445_v49 }
 0xde7   : > { %v5792_v56 = vpop.eup %5791 }
 0xde8   : > { %v2447_v57 = vmul.f32 %v5792_v56, %v5790_v53 }
 0xdea   : > { %5505 = vmatmul.mubr.msk.f32.vlgmr.msra.gmra.mxu0 %vm903_vm2, %v2447_v57 }
 0xdeb   : > { %5520 = vmatprep.mubr.msk.f32.mxu0 %vm5878_vm1, %v5877_v7  ;;  %5513 = vmatpush3.msra.mxu0 %v5023_v11 }
 0xdec   : > { %5514 = vmatprep.subr.mxu0 %v5877_v7 }
 0xded   : > { %5515 = vmatpush3.msra.mxu0 %v5022_v14  ;;  %v5061_v14 = vld [vmem:[%s6928_s10 + $0xb0] sm:$0xff] }
 0xdee   : > { %5516 = vmatprep.subr.mxu0 %v5877_v7 }
 0xdef   : > { %5517 = vmatpush3.msra.mxu0 %v5021_v16  ;;  %v5059_v16 = vld [vmem:[%s6928_s10 + $0xa0] sm:$0xff] }
 0xdf0   : > { %5518 = vmatprep.subr.mxu0 %v5877_v7 }
 0xdf1   : > { %5519 = vmatpush3.msra.mxu0 %v5020_v17 }
 0xdf2   : > { %5534 = vmatprep.subr.mxu0 %v5877_v7 }
 0xeaa   : > { %v2517_v58 = vpop.f32.mrf.mxu0 }
 0xeab   : > { %5510 = vmatmul.mubr.msk.f32.vlgmr.msra.gmra.mxu1 %vm903_vm2, %v2517_v58 }
 0xeac   : > { %v5506_v59 = vpop.f32.mrf.mxu0  ;;  %5531 = vmatprep.mubr.msk.f32.mxu1 %vm5878_vm1, %v5877_v7  ;;  %5524 = vmatpush3.msra.mxu1 %v5030_v10 }
 0xead   : > { %5525 = vmatprep.subr.mxu1 %v5877_v7 }
 0xf6b   : > { %v2592_v60 = vpop.f32.mrf.mxu1 }
 0xf6c   : > { %v2596_v62 = vadd.f32 %v2592_v60, %v2110_v36  ;;  %v5032_v36 = vld [vmem:[%s6927_s9 + $0x4] ss:$0 sm:$0xff] }
 0xf6d   : > { %v5511_v63 = vpop.f32.mrf.mxu1 }
 0xf6e   : > { %v2604_v1 = vadd.f32 %v5015_v61, %v2596_v62  ;;  %v5055_v62 = vld [vmem:[%s6926_s8 + $0xb8] sm:$0xff]  ;;  %v5054_v63 = vld [vmem:[%s6926_s8 + $0xb0] sm:$0xff] }
 0xf70   : > { %v6424_v2 = vadd.f32 %v2604_v1, %v6031_v0  ;;  %v5029_v0 = vld [vmem:[%s6926_s8 + $0x90] sm:$0xff]  ;;  %v5053_v1 = vld [vmem:[%s6926_s8 + $0xa8] sm:$0xff] }
 0xf71   : > { %5526 = vmatpush3.msra.mxu1 %v5029_v0 }
 0xf72   : > { %v2606_v3 = vsel %vm626_vm0, %v6424_v2, 0.0  ;;  %5527 = vmatprep.subr.mxu1 %v5877_v7 }
 0xf73   : > { %2607 = vadd.xlane.f32.xlu0 %v2606_v3  ;;  %5528 = vmatpush3.msra.mxu1 %v5028_v12  ;;  %v5052_v3 = vld [vmem:[%s6926_s8 + $0xa0] sm:$0xff]  ;;  %v5062_v12 = vld [vmem:[%s6928_s10 + $0xb8] sm:$0xff] }
 0xf74   : > { %5529 = vmatprep.subr.mxu1 %v5877_v7 }
 0xf75   : > { %5530 = vmatpush3.msra.mxu1 %v5027_v15  ;;  %v5060_v15 = vld [vmem:[%s6928_s10 + $0xa8] sm:$0xff] }
 0xf76   : > { %5532 = vmatmul.mubr.msk.f32.vlgmr.msra.gmra.mxu1 %vm626_vm0, %v6448_v13  ;;  %5545 = vmatprep.subr.mxu1 %v5877_v7 }
 0xf77   : > { %5547 = vmatprep.mubr.msk.f32.mxu1 %vm5878_vm1, %v5877_v7 }
 0xffc   : > { %v2608_v4 = vpop.xlane.xlu0 %2607 }
 0xffd   : > { %v2609_v5 = vmul.f32 0.03125, %v2608_v4 }
 0xfff   : > { %v2610_v6 = vsub.f32 %v6424_v2, %v2609_v5 }
0x1001   : > { %v2611_v8 = vmul.f32 %v2610_v6, %v2610_v6 }
0x1003   : > { %v2612_v9 = vsel %vm626_vm0, %v2611_v8, 0.0 }
0x1004   : > { %2613 = vadd.xlane.f32.xlu1 %v2612_v9  ;;  %v5050_v9 = vld [vmem:[%s6925_s7 + $0x5] ss:$0 sm:$0xff] }
0x1036   : > { %v2805_v37 = vpop.f32.mrf.mxu1 }
0x1037   : > { %v2806_v38 = vadd.f32 %v5032_v36, %v2805_v37  ;;  %v5044_v36 = vld [vmem:[%s6930_s12 + $0x20] sm:$0xff]  ;;  %v5082_v37 = vld [vmem:[%s6926_s8 + $0xd8] sm:$0xff] }
0x1038   : > { %v5533_v39 = vpop.f32.mrf.mxu1 }
0x1039   : > { %5546 = vmatpush3.xpose.msk.msra.mxu1 %vm903_vm2, %v2806_v38  ;;  %v5081_v38 = vld [vmem:[%s6926_s8 + $0xd0] sm:$0xff]  ;;  %v5080_v39 = vld [vmem:[%s6926_s8 + $0xc8] sm:$0xff] }
0x103a   : > { %5550 = vmatprep.subr.mxu1 %v5877_v7 }
0x108d   : > { %v2614_v18 = vpop.xlane.xlu1 %2613 }
0x108e   : > { %v2615_v19 = vmul.f32 0.03125, %v2614_v18 }
0x1090   : > { %v2616_v20 = vadd.f32 1e-05, %v2615_v19 }
0x1092   : > { %5793 = vrsqrt.f32 %v2616_v20 }
0x109f   : > { %v5794_v21 = vpop.eup %5793 }
0x10a0   : > { %v2618_v23 = vmul.f32 %v5794_v21, %v2610_v6  ;;  %v5057_v6 = vld [vmem:[%s6927_s9 + $0x5] ss:$0 sm:$0xff] }
0x10a2   : > { %v2627_v26 = vmul.f32 %v5017_v22, %v2618_v23 }
0x10a4   : > { %v6478_v27 = vadd.f32 %v5019_v25, %v2627_v26 }
0x10a6   : > { %5521 = vmatmul.mubr.msk.f32.vlgmr.msra.gmra.mxu0 %vm626_vm0, %v6478_v27 }
0x10a7   : > { %5535 = vmatpush3.msra.mxu0 %v5037_v28  ;;  %5542 = vmatprep.mubr.msk.f32.mxu0 %vm5878_vm1, %v5877_v7  ;;  %v5064_v28 = vld [vmem:[%s6929_s11 + $0x5] ss:$0 sm:$0xff] }
0x10a8   : > { %5536 = vmatprep.subr.mxu0 %v5877_v7 }
0x10a9   : > { %5537 = vmatpush3.msra.mxu0 %v5036_v29 }
0x10aa   : > { %5538 = vmatprep.subr.mxu0 %v5877_v7 }
0x10ab   : > { %5539 = vmatpush3.msra.mxu0 %v5035_v30 }
0x10ac   : > { %5540 = vmatprep.subr.mxu0 %v5877_v7 }
0x10ad   : > { %5541 = vmatpush3.msra.mxu0 %v5034_v31 }
0x10ae   : > { %5555 = vmatprep.subr.mxu0 %v5877_v7  ;;  %5543 = vmatmul.mubr.msk.f32.vlgmr.msra.gmra.mxu0 %vm626_vm0, %v6448_v13 }
0x10af   : > { %5556 = vmatpush3.msra.mxu0 %v5048_v32  ;;  %5563 = vmatprep.mubr.msk.f32.mxu0 %vm5878_vm1, %v5877_v7  ;;  %v5069_v32 = vld [vmem:[%s6930_s12 + $0x28] sm:$0xff] }
0x10b0   : > { %5557 = vmatprep.subr.mxu0 %v5877_v7 }
0x10b1   : > { %5558 = vmatpush3.msra.mxu0 %v5047_v33 }
0x10b2   : > { %5559 = vmatprep.subr.mxu0 %v5877_v7 }
0x10b3   : > { %5560 = vmatpush3.msra.mxu0 %v5046_v34 }
0x10b4   : > { %5561 = vmatprep.subr.mxu0 %v5877_v7 }
0x10b5   : > { %5562 = vmatpush3.msra.mxu0 %v5045_v35 }
0x10b6   : > { %5564 = vmatmul.mubr.msk.f32.vlgmr.msra.gmra.mxu0 %vm626_vm0, %v6478_v27  ;;  %5577 = vmatprep.subr.mxu0 %v5877_v7 }
0x10b7   : > { %5585 = vmatprep.mubr.msk.f32.mxu0 %vm5878_vm1, %v5877_v7  ;;  %5578 = vmatpush3.msra.mxu0 %v5062_v12 }
0x10b8   : > { %5579 = vmatprep.subr.mxu0 %v5877_v7 }
0x10b9   : > { %5580 = vmatpush3.msra.mxu0 %v5061_v14 }
0x10ba   : > { %5581 = vmatprep.subr.mxu0 %v5877_v7 }
0x10bb   : > { %5582 = vmatpush3.msra.mxu0 %v5060_v15  ;;  %v5096_v15 = vld [vmem:[%s6930_s12 + $0x30] sm:$0xff] }
0x10bc   : > { %5583 = vmatprep.subr.mxu0 %v5877_v7 }
0x10bd   : > { %5584 = vmatpush3.msra.mxu0 %v5059_v16 }
0x10be   : > { %5586 = vmatmul.mubr.msk.f32.vlgmr.msra.gmra.mxu0 %vm626_vm0, %v6448_v13  ;;  %5598 = vmatprep.subr.mxu0 %v5877_v7 }
0x10bf   : > { %5600 = vmatprep.mubr.msk.f32.mxu0 %vm5878_vm1, %v5877_v7  ;;  %5599 = vmatpush3.msra.mxu0 %v5069_v32 }
0x10c0   : > { %5608 = vmatprep.subr.mxu0 %v5877_v7 }
0x1166   : > { %v2719_v40 = vpop.f32.mrf.mxu0 }
0x1167   : > { %v2720_v41 = vadd.f32 %v5025_v24, %v2719_v40  ;;  %v5079_v24 = vld [vmem:[%s6926_s8 + $0xc0] sm:$0xff]  ;;  %v5075_v40 = vld [vmem:[%s6924_s6 + $0xd8] sm:$0xff] }
0x1168   : > { %v5522_v43 = vpop.f32.mrf.mxu0 }
0x1169   : > { %5548 = vmatmul.mubr.msk.f32.vlgmr.msra.gmra.mxu1 %vm903_vm2, %v2720_v41  ;;  %v5074_v43 = vld [vmem:[%s6924_s6 + $0xd0] sm:$0xff] }
0x116a   : > { %5552 = vmatprep.mubr.msk.f32.mxu1 %vm5878_vm1, %v5877_v7 }
0x116e   : > { %v2888_v44 = vpop.f32.mrf.mxu0 }
0x116f   : > { %v2889_v45 = vadd.f32 %v5039_v42, %v2888_v44  ;;  %v5073_v44 = vld [vmem:[%s6924_s6 + $0xc8] sm:$0xff] }
0x1170   : > { %v5544_v46 = vpop.f32.mrf.mxu0 }
0x1171   : > { %5551 = vmatpush3.msra.mxu1 %v2889_v45  ;;  %v5072_v46 = vld [vmem:[%s6924_s6 + $0xc0] sm:$0xff] }
0x1172   : > { %5566 = vmatprep.subr.mxu1 %v5877_v7 }
0x1176   : > { %v3135_v47 = vpop.f32.mrf.mxu0 }
0x1177   : > { %v3136_v11 = vadd.f32 %v5050_v9, %v3135_v47 }
0x1178   : > { %v5565_v48 = vpop.f32.mrf.mxu0 }
0x1179   : > { %v5084_v48 = vld [vmem:[%s6927_s9 + $0x6] ss:$0 sm:$0xff] }
0x117e   : > { %v3301_v29 = vpop.f32.mrf.mxu0 }
0x117f   : > { %v3302_v30 = vadd.f32 %v5064_v28, %v3301_v29  ;;  %v5105_v29 = vld [vmem:[%s6926_s8 + $0xe0] sm:$0xff] }
0x1180   : > { %v5587_v31 = vpop.f32.mrf.mxu0 }
0x1229   : > { %v2964_v51 = vpop.f32.mrf.mxu1 }
0x122a   : > { %v2969_v52 = vsel %vm2968_vm4, -10000.0, %v2964_v51 }
0x122b   : > { %v5549_v53 = vpop.f32.mrf.mxu1  ;;  %v2970_v54 = vsel %vm903_vm2, %v2969_v52, -inf }
0x122c   : > { %2971 = vmax.xlane.f32.xlu0 %v2970_v54 }
0x12b5   : > { %v2972_v55 = vpop.xlane.xlu0 %2971 }
0x12b6   : > { %v2973_v49 = vsub.f32 %v2969_v52, %v2972_v55 }
0x12b8   : > { %v2974_v56 = vmul.f32 1.442695, %v2973_v49  ;;  %v5077_v49 = vld [vmem:[%s6925_s7 + $0x6] ss:$0 sm:$0xff] }
0x12ba   : > { %5795 = vpow2.f32 %v2974_v56 }
0x12c7   : > { %v5796_v57 = vpop.eup %5795 }
0x12c8   : > { %v2976_v58 = vsel %vm903_vm2, %v5796_v57, 0.0 }
0x12c9   : > { %2977 = vadd.xlane.f32.xlu1 %v2976_v58 }
0x1352   : > { %v2978_v59 = vpop.xlane.xlu1 %2977 }
0x1353   : > { %5797 = vrcp.f32 %v2978_v59  ;;  %v5089_v59 = vld [vmem:[%s6928_s10 + $0xd8] sm:$0xff] }
0x1360   : > { %v5798_v60 = vpop.eup %5797 }
0x1361   : > { %v2980_v61 = vmul.f32 %v5798_v60, %v5796_v57  ;;  %v5088_v60 = vld [vmem:[%s6928_s10 + $0xd0] sm:$0xff] }
0x1363   : > { %5553 = vmatmul.mubr.msk.f32.vlgmr.msra.gmra.mxu1 %vm903_vm2, %v2980_v61  ;;  %v5087_v61 = vld [vmem:[%s6928_s10 + $0xc8] sm:$0xff] }
0x1364   : > { %5567 = vmatpush3.msra.mxu1 %v5055_v62  ;;  %5574 = vmatprep.mubr.msk.f32.mxu1 %vm5878_vm1, %v5877_v7  ;;  %v5086_v62 = vld [vmem:[%s6928_s10 + $0xc0] sm:$0xff] }
0x1365   : > { %5568 = vmatprep.subr.mxu1 %v5877_v7 }
0x1366   : > { %5569 = vmatpush3.msra.mxu1 %v5054_v63 }
0x1367   : > { %5570 = vmatprep.subr.mxu1 %v5877_v7 }
0x1368   : > { %5571 = vmatpush3.msra.mxu1 %v5053_v1 }
0x1369   : > { %5572 = vmatprep.subr.mxu1 %v5877_v7 }
0x136a   : > { %5573 = vmatpush3.msra.mxu1 %v5052_v3 }
0x136b   : > { %5575 = vmatmul.mubr.msk.f32.vlgmr.msra.gmra.mxu1 %vm626_vm0, %v6448_v13  ;;  %5588 = vmatprep.subr.mxu1 %v5877_v7 }
0x136c   : > { %5590 = vmatprep.mubr.msk.f32.mxu1 %vm5878_vm1, %v5877_v7 }
0x1423   : > { %v3050_v4 = vpop.f32.mrf.mxu1 }
0x1425   : > { %v5554_v5 = vpop.f32.mrf.mxu1 }
0x142b   : > { %v3218_v8 = vpop.f32.mrf.mxu1 }
0x142c   : > { %v3219_v10 = vadd.f32 %v5057_v6, %v3218_v8 }
0x142d   : > { %v5576_v0 = vpop.f32.mrf.mxu1 }
0x142e   : > { %5589 = vmatpush3.xpose.msk.msra.mxu1 %vm903_vm2, %v3219_v10  ;;  %v5091_v0 = vld [vmem:[%s6929_s11 + $0x6] ss:$0 sm:$0xff] }
0x142f   : > { %5593 = vmatprep.subr.mxu1 %v5877_v7 }
0x1431   : > { %5591 = vmatmul.mubr.msk.f32.vlgmr.msra.gmra.mxu1 %vm903_vm2, %v3136_v11 }
0x1432   : > { %5595 = vmatprep.mubr.msk.f32.mxu1 %vm5878_vm1, %v5877_v7  ;;  %5594 = vmatpush3.msra.mxu1 %v3302_v30 }
0x1433   : > { %5603 = vmatprep.subr.mxu1 %v5877_v7 }
0x14f1   : > { %v3377_v17 = vpop.f32.mrf.mxu1 }
0x14f2   : > { %v3381_v18 = vsel %vm2968_vm4, -10000.0, %v3377_v17 }
0x14f3   : > { %v5592_v19 = vpop.f32.mrf.mxu1  ;;  %v3382_v20 = vsel %vm903_vm2, %v3381_v18, -inf }
0x14f4   : > { %3383 = vmax.xlane.f32.xlu0 %v3382_v20  ;;  %v5101_v19 = vld [vmem:[%s6924_s6 + $0xf8] sm:$0xff]  ;;  %v5100_v20 = vld [vmem:[%s6924_s6 + $0xf0] sm:$0xff] }
0x157d   : > { %v3384_v21 = vpop.xlane.xlu0 %3383 }
0x157e   : > { %v3385_v22 = vsub.f32 %v3381_v18, %v3384_v21  ;;  %v5099_v21 = vld [vmem:[%s6924_s6 + $0xe8] sm:$0xff] }
0x1580   : > { %v3386_v23 = vmul.f32 1.442695, %v3385_v22  ;;  %v5098_v22 = vld [vmem:[%s6924_s6 + $0xe0] sm:$0xff] }
0x1582   : > { %5799 = vpow2.f32 %v3386_v23  ;;  %v5108_v23 = vld [vmem:[%s6926_s8 + $0xf8] sm:$0xff] }
0x158f   : > { %v5800_v25 = vpop.eup %5799 }
0x1590   : > { %v3388_v26 = vsel %vm903_vm2, %v5800_v25, 0.0 }
0x1591   : > { %3389 = vadd.xlane.f32.xlu1 %v3388_v26  ;;  %v5107_v26 = vld [vmem:[%s6926_s8 + $0xf0] sm:$0xff] }
0x161a   : > { %v3390_v33 = vpop.xlane.xlu1 %3389 }
0x161b   : > { %5801 = vrcp.f32 %v3390_v33 }
0x1628   : > { %v5802_v34 = vpop.eup %5801 }
0x1629   : > { %v3392_v35 = vmul.f32 %v5802_v34, %v5800_v25 }
0x162b   : > { %5596 = vmatmul.mubr.msk.f32.vlgmr.msra.gmra.mxu1 %vm903_vm2, %v3392_v35 }
0x162c   : > { %5604 = vmatpush3.msra.mxu1 %v5044_v36  ;;  %5605 = vmatprep.mubr.msk.f32.mxu1 %vm5878_vm1, %v5877_v7  ;;  %v5110_v36 = vld [vmem:[%s6927_s9 + $0x7] ss:$0 sm:$0xff] }
0x162d   : > { %5619 = vmatprep.subr.mxu1 %v5877_v7 }
0x162f   : > { %5606 = vmatmul.mubr.msk.f32.vlgmr.msra.gmra.mxu1 %vm903_vm2, %v3050_v4 }
0x1630   : > { %5620 = vmatpush3.msra.mxu1 %v5082_v37  ;;  %5627 = vmatprep.mubr.msk.f32.mxu1 %vm5878_vm1, %v5877_v7 }
0x1631   : > { %5621 = vmatprep.subr.mxu1 %v5877_v7 }
0x1632   : > { %5622 = vmatpush3.msra.mxu1 %v5081_v38  ;;  %v5103_v38 = vld [vmem:[%s6925_s7 + $0x7] ss:$0 sm:$0xff] }
0x1633   : > { %5623 = vmatprep.subr.mxu1 %v5877_v7 }
0x1634   : > { %5624 = vmatpush3.msra.mxu1 %v5080_v39 }
0x1635   : > { %5625 = vmatprep.subr.mxu1 %v5877_v7 }
0x1636   : > { %5626 = vmatpush3.msra.mxu1 %v5079_v24 }
0x1637   : > { %5628 = vmatmul.mubr.msk.f32.vlgmr.msra.gmra.mxu1 %vm626_vm0, %v6448_v13  ;;  %5641 = vmatprep.subr.mxu1 %v5877_v7 }
0x1638   : > { %5643 = vmatprep.mubr.msk.f32.mxu1 %vm5878_vm1, %v5877_v7 }
0x16eb   : > { %v3462_v41 = vpop.f32.mrf.mxu1 }
0x16ec   : > { %5601 = vmatmul.mubr.msk.f32.vlgmr.msra.gmra.mxu0 %vm903_vm2, %v3462_v41  ;;  %v5115_v41 = vld [vmem:[%s6928_s10 + $0xf8] sm:$0xff] }
0x16ed   : > { %5609 = vmatpush3.msra.mxu0 %v5075_v40  ;;  %v5597_v42 = vpop.f32.mrf.mxu1  ;;  %5616 = vmatprep.mubr.msk.f32.mxu0 %vm5878_vm1, %v5877_v7 }
0x16ee   : > { %5610 = vmatprep.subr.mxu0 %v5877_v7  ;;  %v5113_v42 = vld [vmem:[%s6928_s10 + $0xe8] sm:$0xff] }
0x16ef   : > { %5611 = vmatpush3.msra.mxu0 %v5074_v43  ;;  %v6659_v45 = vpop.f32.mrf.mxu1  ;;  %v5114_v43 = vld [vmem:[%s6928_s10 + $0xf0] sm:$0xff] }
0x16f0   : > { %5612 = vmatprep.subr.mxu0 %v5877_v7 }
0x16f1   : > { %5613 = vmatpush3.msra.mxu0 %v5073_v44  ;;  %v5607_v47 = vpop.f32.mrf.mxu1  ;;  %v5112_v44 = vld [vmem:[%s6928_s10 + $0xe0] sm:$0xff] }
0x16f2   : > { %5614 = vmatprep.subr.mxu0 %v5877_v7 }
0x16f3   : > { %5615 = vmatpush3.msra.mxu0 %v5072_v46 }
0x16f4   : > { %5617 = vmatmul.mubr.msk.f32.vlgmr.msra.gmra.mxu0 %vm626_vm0, %v6478_v27  ;;  %5630 = vmatprep.subr.mxu0 %v5877_v7 }
0x16f5   : > { %5638 = vmatprep.mubr.msk.f32.mxu0 %vm5878_vm1, %v5877_v7  ;;  %5631 = vmatpush3.msra.mxu0 %v5089_v59 }
0x16f6   : > { %5632 = vmatprep.subr.mxu0 %v5877_v7 }
0x16f7   : > { %v3776_v51 = vpop.f32.mrf.mxu1  ;;  %5633 = vmatpush3.msra.mxu0 %v5088_v60 }
0x16f8   : > { %v3777_v52 = vadd.f32 %v5084_v48, %v3776_v51  ;;  %5634 = vmatprep.subr.mxu0 %v5877_v7 }
0x16f9   : > { %v5629_v53 = vpop.f32.mrf.mxu1  ;;  %5635 = vmatpush3.msra.mxu0 %v5087_v61 }
0x16fa   : > { %5642 = vmatpush3.xpose.msk.msra.mxu1 %vm903_vm2, %v3777_v52  ;;  %5636 = vmatprep.subr.mxu0 %v5877_v7 }
0x16fb   : > { %5646 = vmatprep.subr.mxu1 %v5877_v7  ;;  %5637 = vmatpush3.msra.mxu0 %v5086_v62 }
0x16fc   : > { %5639 = vmatmul.mubr.msk.f32.vlgmr.msra.gmra.mxu0 %vm626_vm0, %v6448_v13  ;;  %5651 = vmatprep.subr.mxu0 %v5877_v7 }
0x16fd   : > { %5653 = vmatprep.mubr.msk.f32.mxu0 %vm5878_vm1, %v5877_v7  ;;  %5652 = vmatpush3.msra.mxu0 %v5096_v15  ;;  %v4628_v15 = vld [vmem:[%s6932_s14 + $0x8] sm:$0xff] }
0x16fe   : > { %5667 = vmatprep.subr.mxu0 %v5877_v7 }
0x17ac   : > { %v6676_v54 = vpop.f32.mrf.mxu0 }
0x17ad   : > { %v3611_v32 = vadd.f32 %v6659_v45, %v6676_v54 }
0x17ae   : > { %v5602_v55 = vpop.f32.mrf.mxu0 }
0x17af   : > { %v5117_v55 = vld [vmem:[%s6929_s11 + $0x7] ss:$0 sm:$0xff] }
0x17b4   : > { %v3693_v56 = vpop.f32.mrf.mxu0 }
0x17b5   : > { %v3694_v57 = vadd.f32 %v5077_v49, %v3693_v56 }
0x17b6   : > { %v5618_v58 = vpop.f32.mrf.mxu0 }
0x17b7   : > { %5644 = vmatmul.mubr.msk.f32.vlgmr.msra.gmra.mxu1 %vm903_vm2, %v3694_v57  ;;  %v5122_v57 = vld [vmem:[%s6930_s12 + $0x38] sm:$0xff] }
0x17b8   : > { %5648 = vmatprep.mubr.msk.f32.mxu1 %vm5878_vm1, %v5877_v7 }
0x17bc   : > { %v3859_v11 = vpop.f32.mrf.mxu0 }
0x17bd   : > { %v3860_v12 = vadd.f32 %v5091_v0, %v3859_v11 }
0x17be   : > { %v5640_v14 = vpop.f32.mrf.mxu0 }
0x17bf   : > { %5647 = vmatpush3.msra.mxu1 %v3860_v12  ;;  %v4630_v14 = vld [vmem:[%s6932_s14 + $0x18] sm:$0xff] }
0x17c0   : > { %5656 = vmatprep.subr.mxu1 %v5877_v7 }
0x1877   : > { %v3935_v63 = vpop.f32.mrf.mxu1 }
0x1878   : > { %v3939_v1 = vsel %vm2968_vm4, -10000.0, %v3935_v63 }
0x1879   : > { %v5645_v3 = vpop.f32.mrf.mxu1  ;;  %v3940_v4 = vsel %vm903_vm2, %v3939_v1, -inf }
0x187a   : > { %3941 = vmax.xlane.f32.xlu0 %v3940_v4 }
0x1903   : > { %v3942_v5 = vpop.xlane.xlu0 %3941 }
0x1904   : > { %v3943_v6 = vsub.f32 %v3939_v1, %v3942_v5  ;;  %v5125_v1 = vld [vmem:[%s6931_s13 + $0x1] ss:$0 sm:$0xff] }
0x1906   : > { %v3944_v8 = vmul.f32 1.442695, %v3943_v6 }
0x1908   : > { %5803 = vpow2.f32 %v3944_v8 }
0x1915   : > { %v5804_v9 = vpop.eup %5803 }
0x1916   : > { %v3946_v10 = vsel %vm903_vm2, %v5804_v9, 0.0 }
0x1917   : > { %3947 = vadd.xlane.f32.xlu1 %v3946_v10 }
0x19a0   : > { %v3948_v16 = vpop.xlane.xlu1 %3947 }
0x19a1   : > { %5805 = vrcp.f32 %v3948_v16  ;;  %v4627_v16 = vld [vmem:[%s6932_s14] sm:$0xff] }
0x19ae   : > { %v5806_v17 = vpop.eup %5805 }
0x19af   : > { %v3950_v18 = vmul.f32 %v5806_v17, %v5804_v9 }
0x19b1   : > { %5649 = vmatmul.mubr.msk.f32.vlgmr.msra.gmra.mxu1 %vm903_vm2, %v3950_v18 }
0x19b2   : > { %5657 = vmatpush3.msra.mxu1 %v5101_v19  ;;  %5664 = vmatprep.mubr.msk.f32.mxu1 %vm5878_vm1, %v5877_v7 }
0x19b3   : > { %5658 = vmatprep.subr.mxu1 %v5877_v7 }
0x19b4   : > { %5659 = vmatpush3.msra.mxu1 %v5100_v20 }
0x19b5   : > { %5660 = vmatprep.subr.mxu1 %v5877_v7 }
0x19b6   : > { %5661 = vmatpush3.msra.mxu1 %v5099_v21  ;;  %v5127_v21 = vld [vmem:[%s6922_s4 + $0x2] ss:$0 sm:$0xff] }
0x19b7   : > { %5662 = vmatprep.subr.mxu1 %v5877_v7 }
0x19b8   : > { %5663 = vmatpush3.msra.mxu1 %v5098_v22 }
0x19b9   : > { %5665 = vmatmul.mubr.msk.f32.vlgmr.msra.gmra.mxu1 %vm626_vm0, %v6478_v27  ;;  %5678 = vmatprep.subr.mxu1 %v5877_v7  ;;  %v5106_v27 = vld [vmem:[%s6926_s8 + $0xe8] sm:$0xff] }
0x19ba   : > { %5686 = vmatprep.mubr.msk.f32.mxu1 %vm5878_vm1, %v5877_v7  ;;  %5679 = vmatpush3.msra.mxu1 %v5115_v41 }
0x19bb   : > { %5680 = vmatprep.subr.mxu1 %v5877_v7 }
0x19bc   : > { %5681 = vmatpush3.msra.mxu1 %v5114_v43  ;;  %v5132_v43 = vld [vmem:[%s6935_s17] ss:$0 sm:$0xff] }
0x19bd   : > { %5682 = vmatprep.subr.mxu1 %v5877_v7 }
0x19be   : > { %5683 = vmatpush3.msra.mxu1 %v5113_v42 }
0x19bf   : > { %5684 = vmatprep.subr.mxu1 %v5877_v7 }
0x19c0   : > { %5685 = vmatpush3.msra.mxu1 %v5112_v44 }
0x19c1   : > { %5687 = vmatmul.mubr.msk.f32.vlgmr.msra.gmra.mxu1 %vm626_vm0, %v6448_v13  ;;  %5699 = vmatprep.subr.mxu1 %v5877_v7 }
0x19c2   : > { %5701 = vmatprep.mubr.msk.f32.mxu1 %vm5878_vm1, %v5877_v7  ;;  %5700 = vmatpush3.msra.mxu1 %v5122_v57 }
0x19c3   : > { %5715 = vmatprep.subr.mxu1 %v5877_v7 }
0x1a71   : > { %v4020_v25 = vpop.f32.mrf.mxu1 }
0x1a72   : > { %5654 = vmatmul.mubr.msk.f32.vlgmr.msra.gmra.mxu0 %vm903_vm2, %v4020_v25 }
0x1a73   : > { %5668 = vmatpush3.msra.mxu0 %v5108_v23  ;;  %v5650_v28 = vpop.f32.mrf.mxu1  ;;  %5675 = vmatprep.mubr.msk.f32.mxu0 %vm5878_vm1, %v5877_v7  ;;  %v5129_v23 = vld [vmem:[%s6923_s5 + $0x2] ss:$0 sm:$0xff] }
0x1a74   : > { %5669 = vmatprep.subr.mxu0 %v5877_v7  ;;  %v4723_v28 = vld [vmem:[%s6934_s16 + $0x38] sm:$0xff] }
0x1a75   : > { %5670 = vmatpush3.msra.mxu0 %v5107_v26 }
0x1a76   : > { %5671 = vmatprep.subr.mxu0 %v5877_v7 }
0x1a77   : > { %5672 = vmatpush3.msra.mxu0 %v5106_v27  ;;  %v4722_v27 = vld [vmem:[%s6934_s16 + $0x30] sm:$0xff] }
0x1a78   : > { %5673 = vmatprep.subr.mxu0 %v5877_v7 }
0x1a79   : > { %v4179_v30 = vpop.f32.mrf.mxu1  ;;  %5674 = vmatpush3.msra.mxu0 %v5105_v29  ;;  %v4721_v29 = vld [vmem:[%s6934_s16 + $0x28] sm:$0xff] }
0x1a7a   : > { %5676 = vmatmul.mubr.msk.f32.vlgmr.msra.gmra.mxu0 %vm626_vm0, %v6448_v13  ;;  %5689 = vmatprep.subr.mxu0 %v5877_v7  ;;  %v4180_v40 = vadd.f32 %v5103_v38, %v4179_v30  ;;  %v4720_v30 = vld [vmem:[%s6934_s16 + $0x20] sm:$0xff] }
0x1a7b   : > { %v5666_v31 = vpop.f32.mrf.mxu1  ;;  %5691 = vmatprep.mubr.msk.f32.mxu0 %vm5878_vm1, %v5877_v7 }
0x1a7c   : > { %v4719_v31 = vld [vmem:[%s6934_s16 + $0x18] sm:$0xff] }
0x1a81   : > { %v4345_v49 = vpop.f32.mrf.mxu1 }
0x1a82   : > { %v4346_v56 = vadd.f32 %v5117_v55, %v4345_v49 }
0x1a83   : > { %v5688_v50 = vpop.f32.mrf.mxu1 }
0x1b32   : > { %v4095_v33 = vpop.f32.mrf.mxu0 }
0x1b33   : > { %v4099_v34 = vadd.f32 %v4095_v33, %v3611_v32  ;;  %v4718_v32 = vld [vmem:[%s6934_s16 + $0x10] sm:$0xff]  ;;  %v4717_v33 = vld [vmem:[%s6934_s16 + $0x8] sm:$0xff] }
0x1b34   : > { %v5655_v35 = vpop.f32.mrf.mxu0 }
0x1b35   : > { %v5130_v35 = vld [vmem:[%s6933_s15] ss:$0 sm:$0xff] }
0x1b3a   : > { %v4262_v37 = vpop.f32.mrf.mxu0 }
0x1b3b   : > { %v4263_v39 = vadd.f32 %v5110_v36, %v4262_v37 }
0x1b3c   : > { %v5677_v24 = vpop.f32.mrf.mxu0 }
0x1b3d   : > { %5690 = vmatpush3.xpose.msk.msra.mxu0 %vm903_vm2, %v4263_v39 }
0x1b3e   : > { %5694 = vmatprep.subr.mxu0 %v5877_v7 }
0x1b40   : > { %5692 = vmatmul.mubr.msk.f32.vlgmr.msra.gmra.mxu0 %vm903_vm2, %v4180_v40 }
0x1b41   : > { %5696 = vmatprep.mubr.msk.f32.mxu0 %vm5878_vm1, %v5877_v7  ;;  %5695 = vmatpush3.msra.mxu0 %v4346_v56 }
0x1b42   : > { %5704 = vmatprep.subr.mxu0 %v5877_v7 }
0x1c00   : > { %v4421_v45 = vpop.f32.mrf.mxu0 }
0x1c01   : > { %v4425_v46 = vsel %vm2968_vm4, -10000.0, %v4421_v45 }
0x1c02   : > { %v5693_v47 = vpop.f32.mrf.mxu0  ;;  %v4426_v48 = vsel %vm903_vm2, %v4425_v46, -inf }
0x1c03   : > { %4427 = vmax.xlane.f32.xlu0 %v4426_v48 }
0x1c8c   : > { %v4428_v51 = vpop.xlane.xlu0 %4427 }
0x1c8d   : > { %v4429_v52 = vsub.f32 %v4425_v46, %v4428_v51 }
0x1c8f   : > { %v4430_v53 = vmul.f32 1.442695, %v4429_v52 }
0x1c91   : > { %5807 = vpow2.f32 %v4430_v53 }
0x1c9e   : > { %v5808_v54 = vpop.eup %5807 }
0x1c9f   : > { %v4432_v13 = vsel %vm903_vm2, %v5808_v54, 0.0 }
0x1ca0   : > { %4433 = vadd.xlane.f32.xlu1 %v4432_v13 }
0x1d29   : > { %v4434_v58 = vpop.xlane.xlu1 %4433 }
0x1d2a   : > { %5809 = vrcp.f32 %v4434_v58 }
0x1d37   : > { %v5810_v59 = vpop.eup %5809 }
0x1d38   : > { %v4436_v60 = vmul.f32 %v5810_v59, %v5808_v54 }
0x1d3a   : > { %5697 = vmatmul.mubr.msk.f32.vlgmr.msra.gmra.mxu0 %vm903_vm2, %v4436_v60 }
0x1d3b   : > { %5712 = vmatprep.mubr.msk.f32.mxu0 %vm5878_vm1, %v5877_v7  ;;  %5705 = vmatpush3.msra.mxu0 %v4630_v14 }
0x1d3c   : > { %5706 = vmatprep.subr.mxu0 %v5877_v7 }
0x1dfa   : > { %v4506_v61 = vpop.f32.mrf.mxu0 }
0x1dfb   : > { %5702 = vmatmul.mubr.msk.f32.vlgmr.msra.gmra.mxu1 %vm903_vm2, %v4506_v61 }
0x1dfc   : > { %v5698_v62 = vpop.f32.mrf.mxu0  ;;  %5731 = vmatprep.mubr.msk.f32.mxu1 %vm5878_vm1, %v5877_v7  ;;  %5716 = vmatpush3.msra.mxu1 %v4723_v28 }
0x1dfd   : > { %5717 = vmatprep.subr.mxu1 %v5877_v7 }
0x1dfe   : > { %5718 = vmatpush3.msra.mxu1 %v4722_v27 }
0x1dff   : > { %5719 = vmatprep.subr.mxu1 %v5877_v7 }
0x1e00   : > { %5720 = vmatpush3.msra.mxu1 %v4721_v29 }
0x1e01   : > { %5721 = vmatprep.subr.mxu1 %v5877_v7 }
0x1e02   : > { %5722 = vmatpush3.msra.mxu1 %v4720_v30 }
0x1e03   : > { %5723 = vmatprep.subr.mxu1 %v5877_v7 }
0x1e04   : > { %5724 = vmatpush3.msra.mxu1 %v4719_v31 }
0x1e05   : > { %5725 = vmatprep.subr.mxu1 %v5877_v7 }
0x1e06   : > { %5726 = vmatpush3.msra.mxu1 %v4718_v32 }
0x1e07   : > { %5727 = vmatprep.subr.mxu1 %v5877_v7 }
0x1e08   : > { %5728 = vmatpush3.msra.mxu1 %v4717_v33 }
0x1e09   : > { %5729 = vmatprep.subr.mxu1 %v5877_v7 }
0x1ebb   : > { %v4581_v63 = vpop.f32.mrf.mxu1 }
0x1ebc   : > { %v4585_v3 = vadd.f32 %v4581_v63, %v4099_v34  ;;  %v4716_v34 = vld [vmem:[%s6934_s16] sm:$0xff] }
0x1ebd   : > { %v5703_v4 = vpop.f32.mrf.mxu1  ;;  %5730 = vmatpush3.msra.mxu1 %v4716_v34 }
0x1ebe   : > { %v4594_v5 = vadd.f32 %v5125_v1, %v4585_v3 }
0x1ec0   : > { %v6817_v6 = vadd.f32 %v4594_v5, %v6424_v2  ;;  %v4629_v2 = vld [vmem:[%s6932_s14 + $0x10] sm:$0xff] }
0x1ec1   : > { %5707 = vmatpush3.msra.mxu0 %v4629_v2 }
0x1ec2   : > { %v4596_v8 = vsel %vm626_vm0, %v6817_v6, 0.0  ;;  %5708 = vmatprep.subr.mxu0 %v5877_v7 }
0x1ec3   : > { %4597 = vadd.xlane.f32.xlu0 %v4596_v8  ;;  %5709 = vmatpush3.msra.mxu0 %v4628_v15 }
0x1ec4   : > { %5710 = vmatprep.subr.mxu0 %v5877_v7 }
0x1ec5   : > { %5711 = vmatpush3.msra.mxu0 %v4627_v16 }
0x1f4c   : > { %v4598_v9 = vpop.xlane.xlu0 %4597 }
0x1f4d   : > { %v4599_v10 = vmul.f32 0.03125, %v4598_v9 }
0x1f4f   : > { %v4600_v0 = vsub.f32 %v6817_v6, %v4599_v10 }
0x1f51   : > { %v4601_v11 = vmul.f32 %v4600_v0, %v4600_v0 }
0x1f53   : > { %v4602_v12 = vsel %vm626_vm0, %v4601_v11, 0.0 }
0x1f54   : > { %4603 = vadd.xlane.f32.xlu1 %v4602_v12 }
0x1fdd   : > { %v4604_v17 = vpop.xlane.xlu1 %4603 }
0x1fde   : > { %v4605_v18 = vmul.f32 0.03125, %v4604_v17 }
0x1fe0   : > { %v4606_v19 = vadd.f32 1e-05, %v4605_v18 }
0x1fe2   : > { %5811 = vrsqrt.f32 %v4606_v19 }
0x1fef   : > { %v5812_v20 = vpop.eup %5811 }
0x1ff0   : > { %v4608_v22 = vmul.f32 %v5812_v20, %v4600_v0 }
0x1ff2   : > { %v4617_v25 = vmul.f32 %v5127_v21, %v4608_v22 }
0x1ff4   : > { %v4626_v26 = vadd.f32 %v5129_v23, %v4617_v25 }
0x1ff6   : > { %5713 = vmatmul.mubr.msk.f32.vlgmr.msra.gmra.mxu0 %vm626_vm0, %v4626_v26 }
0x20b6   : > { %v4707_v36 = vpop.f32.mrf.mxu0 }
0x20b7   : > { %v4708_v37 = vadd.f32 %v5130_v35, %v4707_v36 }
0x20b8   : > { %v5714_v38 = vpop.f32.mrf.mxu0 }
0x20b9   : > { %v4712_v39 = vmul.f32 0.70710677, %v4708_v37  ;;  %v4711_v40 = vmul.f32 0.5, %v4708_v37 }
0x20bb   : > { %5813 = verf.f32 %v4712_v39 }
0x20c8   : > { %v5814_v24 = vpop.eup %5813 }
0x20c9   : > { %v4714_v41 = vadd.f32 1.0, %v5814_v24 }
0x20cb   : > { %v4715_v7 = vmul.f32 %v4714_v41, %v4711_v40 }
0x20cd   : > { %5732 = vmatmul.mubr.msk.f32.vlgmr.msra.gmra.mxu1 %vm4731_vm5, %v4715_v7 }
0x218d   : > { %v4801_v42 = vpop.f32.mrf.mxu1 }
0x218e   : > { %v4802_v44 = vadd.f32 %v5132_v43, %v4801_v42 }
0x218f   : > { %v5733_v45 = vpop.f32.mrf.mxu1 }
0x2190   : > { %v4805_v46 = vadd.f32 %v4802_v44, %v6817_v6 }
0x2192   : > { %4806 = vst.msk [vmem:[%s605_s26] sm:$0xff] %vm626_vm0, %v4805_v46 }
0x2193   : > { %5828 = shalt.err (!%p5825_p3)
}
0x2194   : > { %s5829_s1 = scalar_lea.hbm %s4819_s20, 128  ;;  %s5833_s26 = scalar_lea.hbm %s6936_s18, 256 }
0x2195   : > { %p5830_p4 = scmp.ne.s32.totalorder %s4819_s20, %s5829_s1  ;;  %p5834_p9 = scmp.lt.s32.totalorder %s4819_s20, %s6936_s18 }
0x2196   : > { %p5835_p10 = scmp.lt.s32.totalorder %s5833_s26, %s5829_s1 }
0x2197   : > { %p5831_p7 = pnand %p5830_p4, %p6013_p5 }
0x2198   : > { %p5836_p11 = por %p5835_p10, %p5834_p9 }
0x2199   : > { %p5832_p8 = pneg %p5831_p7 }
0x219b   : > { %p5837_p12 = pnand %p5836_p11, %p5832_p8 }
0x219d   : > { %5840 = shalt.err (!%p5837_p12)
}
0x219e   : > { %5734 = dma.vmem_to_hbm [thread:$0]  (%p6013_p5), %s4822_s19, 128, %s4819_s20, %s4808_s25  }
0x219f PF: > { %s6957_s3 = sld [smem:[#allocation5_spill]]  ;;  %p5740_p13 = scmp.ge.s32.totalorder %s5875_s30, 2 }
0x21a1   : > { %p5737_p0 = pnand %p5740_p13, %p6017_p6 }
0x21a3   : > { %p5738_p1 = pneg %p5737_p0 }
0x21a5   : > { %s4833_s21 = sand.u32 1, %s6957_s3  }
0x21a6   : > { %s4834_s29 = scalar_lea.sflag [#allocation3], %s4833_s21 }
0x21a7   : > { %5858 = dma.done.wait (%p5738_p1), %s4834_s29, 128  }
0x21a8   : > { %5860 = vsyncadd (%p5738_p1), %s4834_s29, 4294967168  ;;  %s6959_s30 = sld [smem:[#allocation7_spill]]  ;;  %s6962_s27 = smov %s5867_s28 }
0x21a9   : > { %s6960_s1 = sld [smem:[#allocation6_spill]] }
0x21aa   : > { %s6961_s29 = sld [smem:[#allocation8_spill]] }
0x21ae   : > { %p28_p2 = scmp.ge.s32.totalorder %s6959_s30, 4  }
0x21af   : > { %s6963_s28 = smov %s6960_s1 }
0x21b0   :  { %30 = sbr.rel (!%p28_p2) target bundleno = 8 (0x8), region = 190 }
0x21b5   :  { %4839 = vsyncpa [#allocation3], 1 }
0x21b6   :  { %4841 = vsyncpa [#allocation3 + $0x1], 1 }

</bundles_post_ra>
